<compile_context>
chip_gen: v7x
topology: tpu7x:2x2x1
jax: 0.10.0
libtpu: 0.0.40
codegen_flags: <defaults>
</compile_context>

<pallas_src>
import functools

import jax
import jax.numpy as jnp
from jax import lax
from jax.experimental import pallas as pl
from jax.experimental.pallas import tpu as pltpu

EPS = 1e-5


def _inst_norm(y, gamma, beta):
    # y: (R, H); gamma/beta: (R, 1). Biased variance over the feature (lane) axis,
    # per-row affine — matches PyTorch InstanceNorm1d(batch) applied to (T, B, H).
    mu = jnp.mean(y, axis=-1, keepdims=True)
    var = jnp.mean((y - mu) ** 2, axis=-1, keepdims=True)
    return (y - mu) * lax.rsqrt(var + EPS) * gamma + beta


def _transition_rnn_kernel(
    x_ref,                      # (T*B, D)
    w1_ref, b1_ref,             # full_1: (D, H), (1, H)
    g1_ref, be1_ref,            # inst_norm_1 affine, tiled per row: (T*B, 1)
    wi_ref, bi_ref,             # fused GRU input weights:  (H, 3H), (1, 3H)  [r|z|n]
    wh_ref, bh_ref,             # fused GRU hidden weights: (H, 3H), (1, 3H)  [r|z|n]
    w2_ref, b2_ref,             # full_2: (H, H), (1, H)
    g2_ref, be2_ref,            # inst_norm_2 affine, tiled per row: (T*B, 1)
    out_ref,                    # (T*B, H)
    gi_scr,                     # (T*B, 3H) scratch: precomputed input-gate activations
    h_all_scr,                  # (T*B, H)  scratch: stacked hidden states
    *, T, B, H,
):
    # ---- Stage 1 (hoisted, batched over all T*B rows): full_1 -> inst_norm_1 -> Wi ----
    y1 = jnp.dot(x_ref[...], w1_ref[...], preferred_element_type=jnp.float32) + b1_ref[...]
    y1n = _inst_norm(y1, g1_ref[...], be1_ref[...])
    gi_scr[...] = jnp.dot(y1n, wi_ref[...], preferred_element_type=jnp.float32) + bi_ref[...]

    wh = wh_ref[...]            # load once, reused every step
    bh = bh_ref[...]

    # ---- Stage 2: serial GRU recurrence; only h @ Wh_fused is on the critical path ----
    def step(t, h):
        off = pl.multiple_of(t * B, B)
        git = gi_scr[pl.ds(off, B), :]                                    # (B, 3H)
        gh = jnp.dot(h, wh, preferred_element_type=jnp.float32) + bh      # (B, 3H)
        r = jax.nn.sigmoid(git[:, 0:H] + gh[:, 0:H])
        z = jax.nn.sigmoid(git[:, H:2 * H] + gh[:, H:2 * H])
        n = jnp.tanh(git[:, 2 * H:3 * H] + r * gh[:, 2 * H:3 * H])
        h_new = (1.0 - z) * n + z * h                                     # PyTorch GRU update
        h_all_scr[pl.ds(off, B), :] = h_new
        return h_new

    h0 = jnp.zeros((B, H), jnp.float32)          # initial_rnn_hidden = zeros(1, B, H)
    lax.fori_loop(0, T, step, h0, unroll=True)

    # ---- Stage 3 (hoisted, batched): full_2 -> inst_norm_2 -> tanh, one pass over T*B ----
    y2 = jnp.dot(h_all_scr[...], w2_ref[...], preferred_element_type=jnp.float32) + b2_ref[...]
    out_ref[...] = jnp.tanh(_inst_norm(y2, g2_ref[...], be2_ref[...]))


def transition_rnn_forward(x, params):
    """x: (T, B, D) float32 (seq-first, as nn.GRU default). Returns (T, B, H) float32."""
    T, B, D = x.shape
    H = params["w1"].shape[1]

    # Fuse GRU gate weights/biases.  Column order r|z|n MUST match the kernel's slices
    # (PyTorch gate order).
    wi = jnp.concatenate([params["wir"], params["wiz"], params["win"]], axis=1)    # (H, 3H)
    bi = jnp.concatenate([params["bir"], params["biz"], params["b_in"]], axis=1)   # (1, 3H)
    wh = jnp.concatenate([params["whr"], params["whz"], params["whn"]], axis=1)    # (H, 3H)
    bh = jnp.concatenate([params["bhr"], params["bhz"], params["bhn"]], axis=1)    # (1, 3H)

    # InstanceNorm1d affine is per batch-channel b; tile to per (t, b) row so the kernel
    # operates on flat (T*B, .) slabs.
    g1 = jnp.tile(params["g1"], (T, 1))      # (T*B, 1)
    be1 = jnp.tile(params["be1"], (T, 1))
    g2 = jnp.tile(params["g2"], (T, 1))
    be2 = jnp.tile(params["be2"], (T, 1))

    x2d = x.reshape(T * B, D)

    vmem = pl.BlockSpec(memory_space=pltpu.MemorySpace.VMEM)   # whole array resident once
    kernel = functools.partial(_transition_rnn_kernel, T=T, B=B, H=H)

    out2d = pl.pallas_call(
        kernel,
        out_shape=jax.ShapeDtypeStruct((T * B, H), jnp.float32),
        in_specs=[vmem] * 13,
        out_specs=vmem,
        scratch_shapes=[
            pltpu.VMEM((T * B, 3 * H), jnp.float32),   # precomputed input gates
            pltpu.VMEM((T * B, H), jnp.float32),       # stacked hidden states
        ],
    )(x2d,
      params["w1"], params["b1"], g1, be1,
      wi, bi, wh, bh,
      params["w2"], params["b2"], g2, be2)

    return out2d.reshape(T, B, H)


def reference_forward(x, p):
    """Pure-JAX reference of the PyTorch forward for verification."""
    T, B, D = x.shape

    def norm(y, g, b):
        mu = y.mean(-1, keepdims=True)
        var = ((y - mu) ** 2).mean(-1, keepdims=True)
        return (y - mu) / jnp.sqrt(var + EPS) * g + b

    y1 = x @ p["w1"] + p["b1"]
    y1n = norm(y1, p["g1"], p["be1"])

    def step(h, xt):
        r = jax.nn.sigmoid(xt @ p["wir"] + p["bir"] + h @ p["whr"] + p["bhr"])
        z = jax.nn.sigmoid(xt @ p["wiz"] + p["biz"] + h @ p["whz"] + p["bhz"])
        n = jnp.tanh(xt @ p["win"] + p["b_in"] + r * (h @ p["whn"] + p["bhn"]))
        hn = (1.0 - z) * n + z * h
        return hn, hn

    H = p["w1"].shape[1]
    _, hs = lax.scan(step, jnp.zeros((B, H), jnp.float32), y1n)
    y2 = hs @ p["w2"] + p["b2"]
    return jnp.tanh(norm(y2, p["g2"], p["be2"]))


def make_params(key, D, H, B):
    ks = jax.random.split(key, 20)
    nrm = lambda k, shape, s=0.1: (s * jax.random.normal(k, shape)).astype(jnp.float32)
    return {
        # full_1: Linear(D, H) — stored transposed for x @ W
        "w1": nrm(ks[0], (D, H)), "b1": nrm(ks[1], (1, H)),
        # inst_norm_1 affine (per batch-channel)
        "g1": 1.0 + nrm(ks[2], (B, 1)), "be1": nrm(ks[3], (B, 1)),
        # GRU (input size = H, hidden size = H), split into r/z/n gates
        "wir": nrm(ks[4], (H, H)), "wiz": nrm(ks[5], (H, H)), "win": nrm(ks[6], (H, H)),
        "whr": nrm(ks[7], (H, H)), "whz": nrm(ks[8], (H, H)), "whn": nrm(ks[9], (H, H)),
        "bir": nrm(ks[10], (1, H)), "biz": nrm(ks[11], (1, H)), "b_in": nrm(ks[12], (1, H)),
        "bhr": nrm(ks[13], (1, H)), "bhz": nrm(ks[14], (1, H)), "bhn": nrm(ks[15], (1, H)),
        # full_2: Linear(H, H)
        "w2": nrm(ks[16], (H, H)), "b2": nrm(ks[17], (1, H)),
        # inst_norm_2 affine
        "g2": 1.0 + nrm(ks[18], (B, 1)), "be2": nrm(ks[19], (B, 1)),
    }


if __name__ == "__main__":
    # Small shapes consistent with the module: seq T=8, batch B=8, input D=16, hidden H=32
    T, B, D, H = 8, 8, 16, 32

    key = jax.random.PRNGKey(0)
    kx, kp = jax.random.split(key)
    x = jax.random.normal(kx, (T, B, D), dtype=jnp.float32)
    params = make_params(kp, D, H, B)

    fwd = jax.jit(transition_rnn_forward)
    out = jax.block_until_ready(fwd(x, params))

    ref = jax.block_until_ready(reference_forward(x, params))
    max_err = float(jnp.max(jnp.abs(out - ref)))
    assert out.shape == (T, B, H), out.shape
    assert max_err < 1e-4, f"mismatch vs reference: {max_err}"

    print("KERNEL_OK")
</pallas_src>

<mosaic_0001>
module attributes {stable_mosaic.version = 11 : i64} {
  func.func @_transition_rnn_kernel(%arg0: memref<64x16xf32, #tpu.memory_space<vmem>>, %arg1: memref<16x32xf32, #tpu.memory_space<vmem>>, %arg2: memref<1x32xf32, #tpu.memory_space<vmem>>, %arg3: memref<64x1xf32, #tpu.memory_space<vmem>>, %arg4: memref<64x1xf32, #tpu.memory_space<vmem>>, %arg5: memref<32x96xf32, #tpu.memory_space<vmem>>, %arg6: memref<1x96xf32, #tpu.memory_space<vmem>>, %arg7: memref<32x96xf32, #tpu.memory_space<vmem>>, %arg8: memref<1x96xf32, #tpu.memory_space<vmem>>, %arg9: memref<32x32xf32, #tpu.memory_space<vmem>>, %arg10: memref<1x32xf32, #tpu.memory_space<vmem>>, %arg11: memref<64x1xf32, #tpu.memory_space<vmem>>, %arg12: memref<64x1xf32, #tpu.memory_space<vmem>>, %arg13: memref<64x32xf32, #tpu.memory_space<vmem>>, %arg14: memref<64x96xf32, #tpu.memory_space<vmem>>, %arg15: memref<64x32xf32, #tpu.memory_space<vmem>>) attributes {dimension_semantics = [], scalar_prefetch = 0 : i64, scratch_operands = 2 : i64, tpu.core_type = #tpu.core_type<tc>} {
    %c0 = arith.constant 0 : index
    %c0_0 = arith.constant 0 : index
    %0 = vector.load %arg0[%c0, %c0_0] : memref<64x16xf32, #tpu.memory_space<vmem>>, vector<64x16xf32>
    %c0_1 = arith.constant 0 : index
    %c0_2 = arith.constant 0 : index
    %1 = vector.load %arg1[%c0_1, %c0_2] : memref<16x32xf32, #tpu.memory_space<vmem>>, vector<16x32xf32>
    %cst = arith.constant dense<0.000000e+00> : vector<64x32xf32>
    %2 = tpu.matmul %0, %1, %cst {dimension_numbers = #tpu.dot_dimension_numbers<[1], [0], [0], [1], [0, 0, 1, 1], [], []>} : vector<64x16xf32>, vector<16x32xf32>, vector<64x32xf32> -> vector<64x32xf32>
    %c0_3 = arith.constant 0 : index
    %c0_4 = arith.constant 0 : index
    %3 = vector.load %arg2[%c0_3, %c0_4] : memref<1x32xf32, #tpu.memory_space<vmem>>, vector<1x32xf32>
    %4 = vector.broadcast %3 : vector<1x32xf32> to vector<64x32xf32>
    %5 = arith.addf %2, %4 : vector<64x32xf32>
    %c0_5 = arith.constant 0 : index
    %c0_6 = arith.constant 0 : index
    %6 = vector.load %arg3[%c0_5, %c0_6] : memref<64x1xf32, #tpu.memory_space<vmem>>, vector<64x1xf32>
    %c0_7 = arith.constant 0 : index
    %c0_8 = arith.constant 0 : index
    %7 = vector.load %arg4[%c0_7, %c0_8] : memref<64x1xf32, #tpu.memory_space<vmem>>, vector<64x1xf32>
    %cst_9 = arith.constant dense<0.000000e+00> : vector<64xf32>
    %8 = vector.multi_reduction <add>, %5, %cst_9 [1] : vector<64x32xf32> to vector<64xf32>
    %9 = vector.shape_cast %8 : vector<64xf32> to vector<64x1xf32>
    %cst_10 = arith.constant 3.200000e+01 : f32
    %10 = vector.broadcast %cst_10 : f32 to vector<64x1xf32>
    %11 = arith.divf %9, %10 : vector<64x1xf32>
    %12 = vector.broadcast %11 : vector<64x1xf32> to vector<64x32xf32>
    %13 = arith.subf %5, %12 : vector<64x32xf32>
    %14 = arith.mulf %13, %13 : vector<64x32xf32>
    %cst_11 = arith.constant dense<0.000000e+00> : vector<64xf32>
    %15 = vector.multi_reduction <add>, %14, %cst_11 [1] : vector<64x32xf32> to vector<64xf32>
    %16 = vector.shape_cast %15 : vector<64xf32> to vector<64x1xf32>
    %cst_12 = arith.constant 3.200000e+01 : f32
    %17 = vector.broadcast %cst_12 : f32 to vector<64x1xf32>
    %18 = arith.divf %16, %17 : vector<64x1xf32>
    %19 = vector.broadcast %11 : vector<64x1xf32> to vector<64x32xf32>
    %20 = arith.subf %5, %19 : vector<64x32xf32>
    %cst_13 = arith.constant 9.99999974E-6 : f32
    %21 = vector.broadcast %cst_13 : f32 to vector<64x1xf32>
    %22 = arith.addf %18, %21 : vector<64x1xf32>
    %23 = math.rsqrt %22 : vector<64x1xf32>
    %24 = vector.broadcast %23 : vector<64x1xf32> to vector<64x32xf32>
    %25 = arith.mulf %20, %24 : vector<64x32xf32>
    %26 = vector.broadcast %6 : vector<64x1xf32> to vector<64x32xf32>
    %27 = arith.mulf %25, %26 : vector<64x32xf32>
    %28 = vector.broadcast %7 : vector<64x1xf32> to vector<64x32xf32>
    %29 = arith.addf %27, %28 : vector<64x32xf32>
    %c0_14 = arith.constant 0 : index
    %c0_15 = arith.constant 0 : index
    %30 = vector.load %arg5[%c0_14, %c0_15] : memref<32x96xf32, #tpu.memory_space<vmem>>, vector<32x96xf32>
    %cst_16 = arith.constant dense<0.000000e+00> : vector<64x96xf32>
    %31 = tpu.matmul %29, %30, %cst_16 {dimension_numbers = #tpu.dot_dimension_numbers<[1], [0], [0], [1], [0, 0, 1, 1], [], []>} : vector<64x32xf32>, vector<32x96xf32>, vector<64x96xf32> -> vector<64x96xf32>
    %c0_17 = arith.constant 0 : index
    %c0_18 = arith.constant 0 : index
    %32 = vector.load %arg6[%c0_17, %c0_18] : memref<1x96xf32, #tpu.memory_space<vmem>>, vector<1x96xf32>
    %33 = vector.broadcast %32 : vector<1x96xf32> to vector<64x96xf32>
    %34 = arith.addf %31, %33 : vector<64x96xf32>
    %c0_19 = arith.constant 0 : index
    %c0_20 = arith.constant 0 : index
    %35 = vector.load %arg14[%c0_19, %c0_20] : memref<64x96xf32, #tpu.memory_space<vmem>>, vector<64x96xf32>
    tpu.vector_store %arg14[%c0_19, %c0_20], %34 {strides = array<i32>} : memref<64x96xf32, #tpu.memory_space<vmem>>, vector<64x96xf32>,
    %c0_21 = arith.constant 0 : index
    %c0_22 = arith.constant 0 : index
    %36 = vector.load %arg7[%c0_21, %c0_22] : memref<32x96xf32, #tpu.memory_space<vmem>>, vector<32x96xf32>
    %c0_23 = arith.constant 0 : index
    %c0_24 = arith.constant 0 : index
    %37 = vector.load %arg8[%c0_23, %c0_24] : memref<1x96xf32, #tpu.memory_space<vmem>>, vector<1x96xf32>
    %cst_25 = arith.constant 0.000000e+00 : f32
    %38 = vector.broadcast %cst_25 : f32 to vector<8x32xf32>
    %c0_i32 = arith.constant 0 : i32
    %c8_i32 = arith.constant 8 : i32
    %39 = arith.muli %c0_i32, %c8_i32 : i32
    %40 = tpu.assume_multiple %39, 8 : i32
    %41 = arith.index_cast %40 : i32 to index
    %c0_26 = arith.constant 0 : index
    %42 = vector.load %arg14[%41, %c0_26] : memref<64x96xf32, #tpu.memory_space<vmem>>, vector<8x96xf32>
    %cst_27 = arith.constant dense<0.000000e+00> : vector<8x96xf32>
    %43 = tpu.matmul %38, %36, %cst_27 {dimension_numbers = #tpu.dot_dimension_numbers<[1], [0], [0], [1], [0, 0, 1, 1], [], []>} : vector<8x32xf32>, vector<32x96xf32>, vector<8x96xf32> -> vector<8x96xf32>
    %44 = vector.broadcast %37 : vector<1x96xf32> to vector<8x96xf32>
    %45 = arith.addf %43, %44 : vector<8x96xf32>
    %46 = vector.extract_strided_slice %42 {offsets = [0, 0], sizes = [8, 32], strides = [1, 1]} : vector<8x96xf32> to vector<8x32xf32>
    %47 = vector.extract_strided_slice %45 {offsets = [0, 0], sizes = [8, 32], strides = [1, 1]} : vector<8x96xf32> to vector<8x32xf32>
    %48 = arith.addf %46, %47 : vector<8x32xf32>
    %49 = arith.negf %48 : vector<8x32xf32>
    %50 = math.exp %49 : vector<8x32xf32>
    %cst_28 = arith.constant 1.000000e+00 : f32
    %51 = vector.broadcast %cst_28 : f32 to vector<8x32xf32>
    %52 = arith.addf %51, %50 : vector<8x32xf32>
    %53 = arith.divf %51, %52 : vector<8x32xf32>
    %54 = vector.extract_strided_slice %42 {offsets = [0, 32], sizes = [8, 32], strides = [1, 1]} : vector<8x96xf32> to vector<8x32xf32>
    %55 = vector.extract_strided_slice %45 {offsets = [0, 32], sizes = [8, 32], strides = [1, 1]} : vector<8x96xf32> to vector<8x32xf32>
    %56 = arith.addf %54, %55 : vector<8x32xf32>
    %57 = arith.negf %56 : vector<8x32xf32>
    %58 = math.exp %57 : vector<8x32xf32>
    %cst_29 = arith.constant 1.000000e+00 : f32
    %59 = vector.broadcast %cst_29 : f32 to vector<8x32xf32>
    %60 = arith.addf %59, %58 : vector<8x32xf32>
    %61 = arith.divf %59, %60 : vector<8x32xf32>
    %62 = vector.extract_strided_slice %42 {offsets = [0, 64], sizes = [8, 32], strides = [1, 1]} : vector<8x96xf32> to vector<8x32xf32>
    %63 = vector.extract_strided_slice %45 {offsets = [0, 64], sizes = [8, 32], strides = [1, 1]} : vector<8x96xf32> to vector<8x32xf32>
    %64 = arith.mulf %53, %63 : vector<8x32xf32>
    %65 = arith.addf %62, %64 : vector<8x32xf32>
    %66 = math.tanh %65 : vector<8x32xf32>
    %cst_30 = arith.constant 1.000000e+00 : f32
    %67 = vector.broadcast %cst_30 : f32 to vector<8x32xf32>
    %68 = arith.subf %67, %61 : vector<8x32xf32>
    %69 = arith.mulf %68, %66 : vector<8x32xf32>
    %70 = arith.mulf %61, %38 : vector<8x32xf32>
    %71 = arith.addf %69, %70 : vector<8x32xf32>
    %72 = arith.index_cast %40 : i32 to index
    %c0_31 = arith.constant 0 : index
    %73 = vector.load %arg15[%72, %c0_31] : memref<64x32xf32, #tpu.memory_space<vmem>>, vector<8x32xf32>
    tpu.vector_store %arg15[%72, %c0_31], %71 {strides = array<i32>} : memref<64x32xf32, #tpu.memory_space<vmem>>, vector<8x32xf32>,
    %c1_i32 = arith.constant 1 : i32
    %c8_i32_32 = arith.constant 8 : i32
    %74 = arith.muli %c1_i32, %c8_i32_32 : i32
    %75 = tpu.assume_multiple %74, 8 : i32
    %76 = arith.index_cast %75 : i32 to index
    %c0_33 = arith.constant 0 : index
    %77 = vector.load %arg14[%76, %c0_33] : memref<64x96xf32, #tpu.memory_space<vmem>>, vector<8x96xf32>
    %cst_34 = arith.constant dense<0.000000e+00> : vector<8x96xf32>
    %78 = tpu.matmul %71, %36, %cst_34 {dimension_numbers = #tpu.dot_dimension_numbers<[1], [0], [0], [1], [0, 0, 1, 1], [], []>} : vector<8x32xf32>, vector<32x96xf32>, vector<8x96xf32> -> vector<8x96xf32>
    %79 = vector.broadcast %37 : vector<1x96xf32> to vector<8x96xf32>
    %80 = arith.addf %78, %79 : vector<8x96xf32>
    %81 = vector.extract_strided_slice %77 {offsets = [0, 0], sizes = [8, 32], strides = [1, 1]} : vector<8x96xf32> to vector<8x32xf32>
    %82 = vector.extract_strided_slice %80 {offsets = [0, 0], sizes = [8, 32], strides = [1, 1]} : vector<8x96xf32> to vector<8x32xf32>
    %83 = arith.addf %81, %82 : vector<8x32xf32>
    %84 = arith.negf %83 : vector<8x32xf32>
    %85 = math.exp %84 : vector<8x32xf32>
    %cst_35 = arith.constant 1.000000e+00 : f32
    %86 = vector.broadcast %cst_35 : f32 to vector<8x32xf32>
    %87 = arith.addf %86, %85 : vector<8x32xf32>
    %88 = arith.divf %86, %87 : vector<8x32xf32>
    %89 = vector.extract_strided_slice %77 {offsets = [0, 32], sizes = [8, 32], strides = [1, 1]} : vector<8x96xf32> to vector<8x32xf32>
    %90 = vector.extract_strided_slice %80 {offsets = [0, 32], sizes = [8, 32], strides = [1, 1]} : vector<8x96xf32> to vector<8x32xf32>
    %91 = arith.addf %89, %90 : vector<8x32xf32>
    %92 = arith.negf %91 : vector<8x32xf32>
    %93 = math.exp %92 : vector<8x32xf32>
    %cst_36 = arith.constant 1.000000e+00 : f32
    %94 = vector.broadcast %cst_36 : f32 to vector<8x32xf32>
    %95 = arith.addf %94, %93 : vector<8x32xf32>
    %96 = arith.divf %94, %95 : vector<8x32xf32>
    %97 = vector.extract_strided_slice %77 {offsets = [0, 64], sizes = [8, 32], strides = [1, 1]} : vector<8x96xf32> to vector<8x32xf32>
    %98 = vector.extract_strided_slice %80 {offsets = [0, 64], sizes = [8, 32], strides = [1, 1]} : vector<8x96xf32> to vector<8x32xf32>
    %99 = arith.mulf %88, %98 : vector<8x32xf32>
    %100 = arith.addf %97, %99 : vector<8x32xf32>
    %101 = math.tanh %100 : vector<8x32xf32>
    %cst_37 = arith.constant 1.000000e+00 : f32
    %102 = vector.broadcast %cst_37 : f32 to vector<8x32xf32>
    %103 = arith.subf %102, %96 : vector<8x32xf32>
    %104 = arith.mulf %103, %101 : vector<8x32xf32>
    %105 = arith.mulf %96, %71 : vector<8x32xf32>
    %106 = arith.addf %104, %105 : vector<8x32xf32>
    %107 = arith.index_cast %75 : i32 to index
    %c0_38 = arith.constant 0 : index
    %108 = vector.load %arg15[%107, %c0_38] : memref<64x32xf32, #tpu.memory_space<vmem>>, vector<8x32xf32>
    tpu.vector_store %arg15[%107, %c0_38], %106 {strides = array<i32>} : memref<64x32xf32, #tpu.memory_space<vmem>>, vector<8x32xf32>,
    %c2_i32 = arith.constant 2 : i32
    %c8_i32_39 = arith.constant 8 : i32
    %109 = arith.muli %c2_i32, %c8_i32_39 : i32
    %110 = tpu.assume_multiple %109, 8 : i32
    %111 = arith.index_cast %110 : i32 to index
    %c0_40 = arith.constant 0 : index
    %112 = vector.load %arg14[%111, %c0_40] : memref<64x96xf32, #tpu.memory_space<vmem>>, vector<8x96xf32>
    %cst_41 = arith.constant dense<0.000000e+00> : vector<8x96xf32>
    %113 = tpu.matmul %106, %36, %cst_41 {dimension_numbers = #tpu.dot_dimension_numbers<[1], [0], [0], [1], [0, 0, 1, 1], [], []>} : vector<8x32xf32>, vector<32x96xf32>, vector<8x96xf32> -> vector<8x96xf32>
    %114 = vector.broadcast %37 : vector<1x96xf32> to vector<8x96xf32>
    %115 = arith.addf %113, %114 : vector<8x96xf32>
    %116 = vector.extract_strided_slice %112 {offsets = [0, 0], sizes = [8, 32], strides = [1, 1]} : vector<8x96xf32> to vector<8x32xf32>
    %117 = vector.extract_strided_slice %115 {offsets = [0, 0], sizes = [8, 32], strides = [1, 1]} : vector<8x96xf32> to vector<8x32xf32>
    %118 = arith.addf %116, %117 : vector<8x32xf32>
    %119 = arith.negf %118 : vector<8x32xf32>
    %120 = math.exp %119 : vector<8x32xf32>
    %cst_42 = arith.constant 1.000000e+00 : f32
    %121 = vector.broadcast %cst_42 : f32 to vector<8x32xf32>
    %122 = arith.addf %121, %120 : vector<8x32xf32>
    %123 = arith.divf %121, %122 : vector<8x32xf32>
    %124 = vector.extract_strided_slice %112 {offsets = [0, 32], sizes = [8, 32], strides = [1, 1]} : vector<8x96xf32> to vector<8x32xf32>
    %125 = vector.extract_strided_slice %115 {offsets = [0, 32], sizes = [8, 32], strides = [1, 1]} : vector<8x96xf32> to vector<8x32xf32>
    %126 = arith.addf %124, %125 : vector<8x32xf32>
    %127 = arith.negf %126 : vector<8x32xf32>
    %128 = math.exp %127 : vector<8x32xf32>
    %cst_43 = arith.constant 1.000000e+00 : f32
    %129 = vector.broadcast %cst_43 : f32 to vector<8x32xf32>
    %130 = arith.addf %129, %128 : vector<8x32xf32>
    %131 = arith.divf %129, %130 : vector<8x32xf32>
    %132 = vector.extract_strided_slice %112 {offsets = [0, 64], sizes = [8, 32], strides = [1, 1]} : vector<8x96xf32> to vector<8x32xf32>
    %133 = vector.extract_strided_slice %115 {offsets = [0, 64], sizes = [8, 32], strides = [1, 1]} : vector<8x96xf32> to vector<8x32xf32>
    %134 = arith.mulf %123, %133 : vector<8x32xf32>
    %135 = arith.addf %132, %134 : vector<8x32xf32>
    %136 = math.tanh %135 : vector<8x32xf32>
    %cst_44 = arith.constant 1.000000e+00 : f32
    %137 = vector.broadcast %cst_44 : f32 to vector<8x32xf32>
    %138 = arith.subf %137, %131 : vector<8x32xf32>
    %139 = arith.mulf %138, %136 : vector<8x32xf32>
    %140 = arith.mulf %131, %106 : vector<8x32xf32>
    %141 = arith.addf %139, %140 : vector<8x32xf32>
    %142 = arith.index_cast %110 : i32 to index
    %c0_45 = arith.constant 0 : index
    %143 = vector.load %arg15[%142, %c0_45] : memref<64x32xf32, #tpu.memory_space<vmem>>, vector<8x32xf32>
    tpu.vector_store %arg15[%142, %c0_45], %141 {strides = array<i32>} : memref<64x32xf32, #tpu.memory_space<vmem>>, vector<8x32xf32>,
    %c3_i32 = arith.constant 3 : i32
    %c8_i32_46 = arith.constant 8 : i32
    %144 = arith.muli %c3_i32, %c8_i32_46 : i32
    %145 = tpu.assume_multiple %144, 8 : i32
    %146 = arith.index_cast %145 : i32 to index
    %c0_47 = arith.constant 0 : index
    %147 = vector.load %arg14[%146, %c0_47] : memref<64x96xf32, #tpu.memory_space<vmem>>, vector<8x96xf32>
    %cst_48 = arith.constant dense<0.000000e+00> : vector<8x96xf32>
    %148 = tpu.matmul %141, %36, %cst_48 {dimension_numbers = #tpu.dot_dimension_numbers<[1], [0], [0], [1], [0, 0, 1, 1], [], []>} : vector<8x32xf32>, vector<32x96xf32>, vector<8x96xf32> -> vector<8x96xf32>
    %149 = vector.broadcast %37 : vector<1x96xf32> to vector<8x96xf32>
    %150 = arith.addf %148, %149 : vector<8x96xf32>
    %151 = vector.extract_strided_slice %147 {offsets = [0, 0], sizes = [8, 32], strides = [1, 1]} : vector<8x96xf32> to vector<8x32xf32>
    %152 = vector.extract_strided_slice %150 {offsets = [0, 0], sizes = [8, 32], strides = [1, 1]} : vector<8x96xf32> to vector<8x32xf32>
    %153 = arith.addf %151, %152 : vector<8x32xf32>
    %154 = arith.negf %153 : vector<8x32xf32>
    %155 = math.exp %154 : vector<8x32xf32>
    %cst_49 = arith.constant 1.000000e+00 : f32
    %156 = vector.broadcast %cst_49 : f32 to vector<8x32xf32>
    %157 = arith.addf %156, %155 : vector<8x32xf32>
    %158 = arith.divf %156, %157 : vector<8x32xf32>
    %159 = vector.extract_strided_slice %147 {offsets = [0, 32], sizes = [8, 32], strides = [1, 1]} : vector<8x96xf32> to vector<8x32xf32>
    %160 = vector.extract_strided_slice %150 {offsets = [0, 32], sizes = [8, 32], strides = [1, 1]} : vector<8x96xf32> to vector<8x32xf32>
    %161 = arith.addf %159, %160 : vector<8x32xf32>
    %162 = arith.negf %161 : vector<8x32xf32>
    %163 = math.exp %162 : vector<8x32xf32>
    %cst_50 = arith.constant 1.000000e+00 : f32
    %164 = vector.broadcast %cst_50 : f32 to vector<8x32xf32>
    %165 = arith.addf %164, %163 : vector<8x32xf32>
    %166 = arith.divf %164, %165 : vector<8x32xf32>
    %167 = vector.extract_strided_slice %147 {offsets = [0, 64], sizes = [8, 32], strides = [1, 1]} : vector<8x96xf32> to vector<8x32xf32>
    %168 = vector.extract_strided_slice %150 {offsets = [0, 64], sizes = [8, 32], strides = [1, 1]} : vector<8x96xf32> to vector<8x32xf32>
    %169 = arith.mulf %158, %168 : vector<8x32xf32>
    %170 = arith.addf %167, %169 : vector<8x32xf32>
    %171 = math.tanh %170 : vector<8x32xf32>
    %cst_51 = arith.constant 1.000000e+00 : f32
    %172 = vector.broadcast %cst_51 : f32 to vector<8x32xf32>
    %173 = arith.subf %172, %166 : vector<8x32xf32>
    %174 = arith.mulf %173, %171 : vector<8x32xf32>
    %175 = arith.mulf %166, %141 : vector<8x32xf32>
    %176 = arith.addf %174, %175 : vector<8x32xf32>
    %177 = arith.index_cast %145 : i32 to index
    %c0_52 = arith.constant 0 : index
    %178 = vector.load %arg15[%177, %c0_52] : memref<64x32xf32, #tpu.memory_space<vmem>>, vector<8x32xf32>
    tpu.vector_store %arg15[%177, %c0_52], %176 {strides = array<i32>} : memref<64x32xf32, #tpu.memory_space<vmem>>, vector<8x32xf32>,
    %c4_i32 = arith.constant 4 : i32
    %c8_i32_53 = arith.constant 8 : i32
    %179 = arith.muli %c4_i32, %c8_i32_53 : i32
    %180 = tpu.assume_multiple %179, 8 : i32
    %181 = arith.index_cast %180 : i32 to index
    %c0_54 = arith.constant 0 : index
    %182 = vector.load %arg14[%181, %c0_54] : memref<64x96xf32, #tpu.memory_space<vmem>>, vector<8x96xf32>
    %cst_55 = arith.constant dense<0.000000e+00> : vector<8x96xf32>
    %183 = tpu.matmul %176, %36, %cst_55 {dimension_numbers = #tpu.dot_dimension_numbers<[1], [0], [0], [1], [0, 0, 1, 1], [], []>} : vector<8x32xf32>, vector<32x96xf32>, vector<8x96xf32> -> vector<8x96xf32>
    %184 = vector.broadcast %37 : vector<1x96xf32> to vector<8x96xf32>
    %185 = arith.addf %183, %184 : vector<8x96xf32>
    %186 = vector.extract_strided_slice %182 {offsets = [0, 0], sizes = [8, 32], strides = [1, 1]} : vector<8x96xf32> to vector<8x32xf32>
    %187 = vector.extract_strided_slice %185 {offsets = [0, 0], sizes = [8, 32], strides = [1, 1]} : vector<8x96xf32> to vector<8x32xf32>
    %188 = arith.addf %186, %187 : vector<8x32xf32>
    %189 = arith.negf %188 : vector<8x32xf32>
    %190 = math.exp %189 : vector<8x32xf32>
    %cst_56 = arith.constant 1.000000e+00 : f32
    %191 = vector.broadcast %cst_56 : f32 to vector<8x32xf32>
    %192 = arith.addf %191, %190 : vector<8x32xf32>
    %193 = arith.divf %191, %192 : vector<8x32xf32>
    %194 = vector.extract_strided_slice %182 {offsets = [0, 32], sizes = [8, 32], strides = [1, 1]} : vector<8x96xf32> to vector<8x32xf32>
    %195 = vector.extract_strided_slice %185 {offsets = [0, 32], sizes = [8, 32], strides = [1, 1]} : vector<8x96xf32> to vector<8x32xf32>
    %196 = arith.addf %194, %195 : vector<8x32xf32>
    %197 = arith.negf %196 : vector<8x32xf32>
    %198 = math.exp %197 : vector<8x32xf32>
    %cst_57 = arith.constant 1.000000e+00 : f32
    %199 = vector.broadcast %cst_57 : f32 to vector<8x32xf32>
    %200 = arith.addf %199, %198 : vector<8x32xf32>
    %201 = arith.divf %199, %200 : vector<8x32xf32>
    %202 = vector.extract_strided_slice %182 {offsets = [0, 64], sizes = [8, 32], strides = [1, 1]} : vector<8x96xf32> to vector<8x32xf32>
    %203 = vector.extract_strided_slice %185 {offsets = [0, 64], sizes = [8, 32], strides = [1, 1]} : vector<8x96xf32> to vector<8x32xf32>
    %204 = arith.mulf %193, %203 : vector<8x32xf32>
    %205 = arith.addf %202, %204 : vector<8x32xf32>
    %206 = math.tanh %205 : vector<8x32xf32>
    %cst_58 = arith.constant 1.000000e+00 : f32
    %207 = vector.broadcast %cst_58 : f32 to vector<8x32xf32>
    %208 = arith.subf %207, %201 : vector<8x32xf32>
    %209 = arith.mulf %208, %206 : vector<8x32xf32>
    %210 = arith.mulf %201, %176 : vector<8x32xf32>
    %211 = arith.addf %209, %210 : vector<8x32xf32>
    %212 = arith.index_cast %180 : i32 to index
    %c0_59 = arith.constant 0 : index
    %213 = vector.load %arg15[%212, %c0_59] : memref<64x32xf32, #tpu.memory_space<vmem>>, vector<8x32xf32>
    tpu.vector_store %arg15[%212, %c0_59], %211 {strides = array<i32>} : memref<64x32xf32, #tpu.memory_space<vmem>>, vector<8x32xf32>,
    %c5_i32 = arith.constant 5 : i32
    %c8_i32_60 = arith.constant 8 : i32
    %214 = arith.muli %c5_i32, %c8_i32_60 : i32
    %215 = tpu.assume_multiple %214, 8 : i32
    %216 = arith.index_cast %215 : i32 to index
    %c0_61 = arith.constant 0 : index
    %217 = vector.load %arg14[%216, %c0_61] : memref<64x96xf32, #tpu.memory_space<vmem>>, vector<8x96xf32>
    %cst_62 = arith.constant dense<0.000000e+00> : vector<8x96xf32>
    %218 = tpu.matmul %211, %36, %cst_62 {dimension_numbers = #tpu.dot_dimension_numbers<[1], [0], [0], [1], [0, 0, 1, 1], [], []>} : vector<8x32xf32>, vector<32x96xf32>, vector<8x96xf32> -> vector<8x96xf32>
    %219 = vector.broadcast %37 : vector<1x96xf32> to vector<8x96xf32>
    %220 = arith.addf %218, %219 : vector<8x96xf32>
    %221 = vector.extract_strided_slice %217 {offsets = [0, 0], sizes = [8, 32], strides = [1, 1]} : vector<8x96xf32> to vector<8x32xf32>
    %222 = vector.extract_strided_slice %220 {offsets = [0, 0], sizes = [8, 32], strides = [1, 1]} : vector<8x96xf32> to vector<8x32xf32>
    %223 = arith.addf %221, %222 : vector<8x32xf32>
    %224 = arith.negf %223 : vector<8x32xf32>
    %225 = math.exp %224 : vector<8x32xf32>
    %cst_63 = arith.constant 1.000000e+00 : f32
    %226 = vector.broadcast %cst_63 : f32 to vector<8x32xf32>
    %227 = arith.addf %226, %225 : vector<8x32xf32>
    %228 = arith.divf %226, %227 : vector<8x32xf32>
    %229 = vector.extract_strided_slice %217 {offsets = [0, 32], sizes = [8, 32], strides = [1, 1]} : vector<8x96xf32> to vector<8x32xf32>
    %230 = vector.extract_strided_slice %220 {offsets = [0, 32], sizes = [8, 32], strides = [1, 1]} : vector<8x96xf32> to vector<8x32xf32>
    %231 = arith.addf %229, %230 : vector<8x32xf32>
    %232 = arith.negf %231 : vector<8x32xf32>
    %233 = math.exp %232 : vector<8x32xf32>
    %cst_64 = arith.constant 1.000000e+00 : f32
    %234 = vector.broadcast %cst_64 : f32 to vector<8x32xf32>
    %235 = arith.addf %234, %233 : vector<8x32xf32>
    %236 = arith.divf %234, %235 : vector<8x32xf32>
    %237 = vector.extract_strided_slice %217 {offsets = [0, 64], sizes = [8, 32], strides = [1, 1]} : vector<8x96xf32> to vector<8x32xf32>
    %238 = vector.extract_strided_slice %220 {offsets = [0, 64], sizes = [8, 32], strides = [1, 1]} : vector<8x96xf32> to vector<8x32xf32>
    %239 = arith.mulf %228, %238 : vector<8x32xf32>
    %240 = arith.addf %237, %239 : vector<8x32xf32>
    %241 = math.tanh %240 : vector<8x32xf32>
    %cst_65 = arith.constant 1.000000e+00 : f32
    %242 = vector.broadcast %cst_65 : f32 to vector<8x32xf32>
    %243 = arith.subf %242, %236 : vector<8x32xf32>
    %244 = arith.mulf %243, %241 : vector<8x32xf32>
    %245 = arith.mulf %236, %211 : vector<8x32xf32>
    %246 = arith.addf %244, %245 : vector<8x32xf32>
    %247 = arith.index_cast %215 : i32 to index
    %c0_66 = arith.constant 0 : index
    %248 = vector.load %arg15[%247, %c0_66] : memref<64x32xf32, #tpu.memory_space<vmem>>, vector<8x32xf32>
    tpu.vector_store %arg15[%247, %c0_66], %246 {strides = array<i32>} : memref<64x32xf32, #tpu.memory_space<vmem>>, vector<8x32xf32>,
    %c6_i32 = arith.constant 6 : i32
    %c8_i32_67 = arith.constant 8 : i32
    %249 = arith.muli %c6_i32, %c8_i32_67 : i32
    %250 = tpu.assume_multiple %249, 8 : i32
    %251 = arith.index_cast %250 : i32 to index
    %c0_68 = arith.constant 0 : index
    %252 = vector.load %arg14[%251, %c0_68] : memref<64x96xf32, #tpu.memory_space<vmem>>, vector<8x96xf32>
    %cst_69 = arith.constant dense<0.000000e+00> : vector<8x96xf32>
    %253 = tpu.matmul %246, %36, %cst_69 {dimension_numbers = #tpu.dot_dimension_numbers<[1], [0], [0], [1], [0, 0, 1, 1], [], []>} : vector<8x32xf32>, vector<32x96xf32>, vector<8x96xf32> -> vector<8x96xf32>
    %254 = vector.broadcast %37 : vector<1x96xf32> to vector<8x96xf32>
    %255 = arith.addf %253, %254 : vector<8x96xf32>
    %256 = vector.extract_strided_slice %252 {offsets = [0, 0], sizes = [8, 32], strides = [1, 1]} : vector<8x96xf32> to vector<8x32xf32>
    %257 = vector.extract_strided_slice %255 {offsets = [0, 0], sizes = [8, 32], strides = [1, 1]} : vector<8x96xf32> to vector<8x32xf32>
    %258 = arith.addf %256, %257 : vector<8x32xf32>
    %259 = arith.negf %258 : vector<8x32xf32>
    %260 = math.exp %259 : vector<8x32xf32>
    %cst_70 = arith.constant 1.000000e+00 : f32
    %261 = vector.broadcast %cst_70 : f32 to vector<8x32xf32>
    %262 = arith.addf %261, %260 : vector<8x32xf32>
    %263 = arith.divf %261, %262 : vector<8x32xf32>
    %264 = vector.extract_strided_slice %252 {offsets = [0, 32], sizes = [8, 32], strides = [1, 1]} : vector<8x96xf32> to vector<8x32xf32>
    %265 = vector.extract_strided_slice %255 {offsets = [0, 32], sizes = [8, 32], strides = [1, 1]} : vector<8x96xf32> to vector<8x32xf32>
    %266 = arith.addf %264, %265 : vector<8x32xf32>
    %267 = arith.negf %266 : vector<8x32xf32>
    %268 = math.exp %267 : vector<8x32xf32>
    %cst_71 = arith.constant 1.000000e+00 : f32
    %269 = vector.broadcast %cst_71 : f32 to vector<8x32xf32>
    %270 = arith.addf %269, %268 : vector<8x32xf32>
    %271 = arith.divf %269, %270 : vector<8x32xf32>
    %272 = vector.extract_strided_slice %252 {offsets = [0, 64], sizes = [8, 32], strides = [1, 1]} : vector<8x96xf32> to vector<8x32xf32>
    %273 = vector.extract_strided_slice %255 {offsets = [0, 64], sizes = [8, 32], strides = [1, 1]} : vector<8x96xf32> to vector<8x32xf32>
    %274 = arith.mulf %263, %273 : vector<8x32xf32>
    %275 = arith.addf %272, %274 : vector<8x32xf32>
    %276 = math.tanh %275 : vector<8x32xf32>
    %cst_72 = arith.constant 1.000000e+00 : f32
    %277 = vector.broadcast %cst_72 : f32 to vector<8x32xf32>
    %278 = arith.subf %277, %271 : vector<8x32xf32>
    %279 = arith.mulf %278, %276 : vector<8x32xf32>
    %280 = arith.mulf %271, %246 : vector<8x32xf32>
    %281 = arith.addf %279, %280 : vector<8x32xf32>
    %282 = arith.index_cast %250 : i32 to index
    %c0_73 = arith.constant 0 : index
    %283 = vector.load %arg15[%282, %c0_73] : memref<64x32xf32, #tpu.memory_space<vmem>>, vector<8x32xf32>
    tpu.vector_store %arg15[%282, %c0_73], %281 {strides = array<i32>} : memref<64x32xf32, #tpu.memory_space<vmem>>, vector<8x32xf32>,
    %c7_i32 = arith.constant 7 : i32
    %c8_i32_74 = arith.constant 8 : i32
    %284 = arith.muli %c7_i32, %c8_i32_74 : i32
    %285 = tpu.assume_multiple %284, 8 : i32
    %286 = arith.index_cast %285 : i32 to index
    %c0_75 = arith.constant 0 : index
    %287 = vector.load %arg14[%286, %c0_75] : memref<64x96xf32, #tpu.memory_space<vmem>>, vector<8x96xf32>
    %cst_76 = arith.constant dense<0.000000e+00> : vector<8x96xf32>
    %288 = tpu.matmul %281, %36, %cst_76 {dimension_numbers = #tpu.dot_dimension_numbers<[1], [0], [0], [1], [0, 0, 1, 1], [], []>} : vector<8x32xf32>, vector<32x96xf32>, vector<8x96xf32> -> vector<8x96xf32>
    %289 = vector.broadcast %37 : vector<1x96xf32> to vector<8x96xf32>
    %290 = arith.addf %288, %289 : vector<8x96xf32>
    %291 = vector.extract_strided_slice %287 {offsets = [0, 0], sizes = [8, 32], strides = [1, 1]} : vector<8x96xf32> to vector<8x32xf32>
    %292 = vector.extract_strided_slice %290 {offsets = [0, 0], sizes = [8, 32], strides = [1, 1]} : vector<8x96xf32> to vector<8x32xf32>
    %293 = arith.addf %291, %292 : vector<8x32xf32>
    %294 = arith.negf %293 : vector<8x32xf32>
    %295 = math.exp %294 : vector<8x32xf32>
    %cst_77 = arith.constant 1.000000e+00 : f32
    %296 = vector.broadcast %cst_77 : f32 to vector<8x32xf32>
    %297 = arith.addf %296, %295 : vector<8x32xf32>
    %298 = arith.divf %296, %297 : vector<8x32xf32>
    %299 = vector.extract_strided_slice %287 {offsets = [0, 32], sizes = [8, 32], strides = [1, 1]} : vector<8x96xf32> to vector<8x32xf32>
    %300 = vector.extract_strided_slice %290 {offsets = [0, 32], sizes = [8, 32], strides = [1, 1]} : vector<8x96xf32> to vector<8x32xf32>
    %301 = arith.addf %299, %300 : vector<8x32xf32>
    %302 = arith.negf %301 : vector<8x32xf32>
    %303 = math.exp %302 : vector<8x32xf32>
    %cst_78 = arith.constant 1.000000e+00 : f32
    %304 = vector.broadcast %cst_78 : f32 to vector<8x32xf32>
    %305 = arith.addf %304, %303 : vector<8x32xf32>
    %306 = arith.divf %304, %305 : vector<8x32xf32>
    %307 = vector.extract_strided_slice %287 {offsets = [0, 64], sizes = [8, 32], strides = [1, 1]} : vector<8x96xf32> to vector<8x32xf32>
    %308 = vector.extract_strided_slice %290 {offsets = [0, 64], sizes = [8, 32], strides = [1, 1]} : vector<8x96xf32> to vector<8x32xf32>
    %309 = arith.mulf %298, %308 : vector<8x32xf32>
    %310 = arith.addf %307, %309 : vector<8x32xf32>
    %311 = math.tanh %310 : vector<8x32xf32>
    %cst_79 = arith.constant 1.000000e+00 : f32
    %312 = vector.broadcast %cst_79 : f32 to vector<8x32xf32>
    %313 = arith.subf %312, %306 : vector<8x32xf32>
    %314 = arith.mulf %313, %311 : vector<8x32xf32>
    %315 = arith.mulf %306, %281 : vector<8x32xf32>
    %316 = arith.addf %314, %315 : vector<8x32xf32>
    %317 = arith.index_cast %285 : i32 to index
    %c0_80 = arith.constant 0 : index
    %318 = vector.load %arg15[%317, %c0_80] : memref<64x32xf32, #tpu.memory_space<vmem>>, vector<8x32xf32>
    tpu.vector_store %arg15[%317, %c0_80], %316 {strides = array<i32>} : memref<64x32xf32, #tpu.memory_space<vmem>>, vector<8x32xf32>,
    %c8_i32_81 = arith.constant 8 : i32
    %c0_82 = arith.constant 0 : index
    %c0_83 = arith.constant 0 : index
    %319 = vector.load %arg15[%c0_82, %c0_83] : memref<64x32xf32, #tpu.memory_space<vmem>>, vector<64x32xf32>
    %c0_84 = arith.constant 0 : index
    %c0_85 = arith.constant 0 : index
    %320 = vector.load %arg9[%c0_84, %c0_85] : memref<32x32xf32, #tpu.memory_space<vmem>>, vector<32x32xf32>
    %cst_86 = arith.constant dense<0.000000e+00> : vector<64x32xf32>
    %321 = tpu.matmul %319, %320, %cst_86 {dimension_numbers = #tpu.dot_dimension_numbers<[1], [0], [0], [1], [0, 0, 1, 1], [], []>} : vector<64x32xf32>, vector<32x32xf32>, vector<64x32xf32> -> vector<64x32xf32>
    %c0_87 = arith.constant 0 : index
    %c0_88 = arith.constant 0 : index
    %322 = vector.load %arg10[%c0_87, %c0_88] : memref<1x32xf32, #tpu.memory_space<vmem>>, vector<1x32xf32>
    %323 = vector.broadcast %322 : vector<1x32xf32> to vector<64x32xf32>
    %324 = arith.addf %321, %323 : vector<64x32xf32>
    %c0_89 = arith.constant 0 : index
    %c0_90 = arith.constant 0 : index
    %325 = vector.load %arg11[%c0_89, %c0_90] : memref<64x1xf32, #tpu.memory_space<vmem>>, vector<64x1xf32>
    %c0_91 = arith.constant 0 : index
    %c0_92 = arith.constant 0 : index
    %326 = vector.load %arg12[%c0_91, %c0_92] : memref<64x1xf32, #tpu.memory_space<vmem>>, vector<64x1xf32>
    %cst_93 = arith.constant dense<0.000000e+00> : vector<64xf32>
    %327 = vector.multi_reduction <add>, %324, %cst_93 [1] : vector<64x32xf32> to vector<64xf32>
    %328 = vector.shape_cast %327 : vector<64xf32> to vector<64x1xf32>
    %cst_94 = arith.constant 3.200000e+01 : f32
    %329 = vector.broadcast %cst_94 : f32 to vector<64x1xf32>
    %330 = arith.divf %328, %329 : vector<64x1xf32>
    %331 = vector.broadcast %330 : vector<64x1xf32> to vector<64x32xf32>
    %332 = arith.subf %324, %331 : vector<64x32xf32>
    %333 = arith.mulf %332, %332 : vector<64x32xf32>
    %cst_95 = arith.constant dense<0.000000e+00> : vector<64xf32>
    %334 = vector.multi_reduction <add>, %333, %cst_95 [1] : vector<64x32xf32> to vector<64xf32>
    %335 = vector.shape_cast %334 : vector<64xf32> to vector<64x1xf32>
    %cst_96 = arith.constant 3.200000e+01 : f32
    %336 = vector.broadcast %cst_96 : f32 to vector<64x1xf32>
    %337 = arith.divf %335, %336 : vector<64x1xf32>
    %338 = vector.broadcast %330 : vector<64x1xf32> to vector<64x32xf32>
    %339 = arith.subf %324, %338 : vector<64x32xf32>
    %cst_97 = arith.constant 9.99999974E-6 : f32
    %340 = vector.broadcast %cst_97 : f32 to vector<64x1xf32>
    %341 = arith.addf %337, %340 : vector<64x1xf32>
    %342 = math.rsqrt %341 : vector<64x1xf32>
    %343 = vector.broadcast %342 : vector<64x1xf32> to vector<64x32xf32>
    %344 = arith.mulf %339, %343 : vector<64x32xf32>
    %345 = vector.broadcast %325 : vector<64x1xf32> to vector<64x32xf32>
    %346 = arith.mulf %344, %345 : vector<64x32xf32>
    %347 = vector.broadcast %326 : vector<64x1xf32> to vector<64x32xf32>
    %348 = arith.addf %346, %347 : vector<64x32xf32>
    %349 = math.tanh %348 : vector<64x32xf32>
    %c0_98 = arith.constant 0 : index
    %c0_99 = arith.constant 0 : index
    %350 = vector.load %arg13[%c0_98, %c0_99] : memref<64x32xf32, #tpu.memory_space<vmem>>, vector<64x32xf32>
    tpu.vector_store %arg13[%c0_98, %c0_99], %349 {strides = array<i32>} : memref<64x32xf32, #tpu.memory_space<vmem>>, vector<64x32xf32>,
    return
  }
}

</mosaic_0001>

<bundles_post_ra>
// kernel: transition_rnn_forward.1
= control target key start
LH: loop header
LB: loop body
LE: loop exit
PB: predicated region body
PF: predicated region fallthrough
CT: control target
= control target key end

     0   :  { %vm62_vm0 = vcmask 130048   ;;  %s2871_s0 = inlined_call_operand.vmem [shape: f32[64,16], index: 0, kind: input, shape index: {}]   ;;  %s2872_s1 = inlined_call_operand.vmem [shape: f32[16,32], index: 1, kind: input, shape index: {}]   ;;  %s2873_s2 = inlined_call_operand.vmem [shape: f32[1,32], index: 2, kind: input, shape index: {}]   ;;  %s2874_s3 = inlined_call_operand.vmem [shape: f32[64,1], index: 3, kind: input, shape index: {}]   ;;  %s2875_s4 = inlined_call_operand.vmem [shape: f32[64,1], index: 4, kind: input, shape index: {}]   ;;  %s2876_s5 = inlined_call_operand.vmem [shape: f32[32,96], index: 5, kind: input, shape index: {}]   ;;  %s2877_s6 = inlined_call_operand.vmem [shape: f32[1,96], index: 6, kind: input, shape index: {}]   ;;  %s2878_s7 = inlined_call_operand.vmem [shape: f32[32,96], index: 7, kind: input, shape index: {}]   ;;  %s2879_s8 = inlined_call_operand.vmem [shape: f32[1,96], index: 8, kind: input, shape index: {}]   ;;  %s2880_s9 = inlined_call_operand.vmem [shape: f32[32,32], index: 9, kind: input, shape index: {}]   ;;  %s2881_s10 = inlined_call_operand.vmem [shape: f32[1,32], index: 10, kind: input, shape index: {}]   ;;  %s2882_s11 = inlined_call_operand.vmem [shape: f32[64,1], index: 11, kind: input, shape index: {}]   ;;  %s2883_s12 = inlined_call_operand.vmem [shape: f32[64,1], index: 12, kind: input, shape index: {}]   ;;  %s2884_s13 = inlined_call_operand.hbm [shape: f32[64,32], index: 13, kind: output, shape index: {}]  }
   0x1   :  { %v53_v0 = vld [vmem:[%s2872_s1] sm:$0xff]  ;;  %v54_v1 = vld [vmem:[%s2872_s1 + $0x8] sm:$0xff] }
   0x2   :  { %v45_v2 = vld [vmem:[%s2871_s0] sm:$0xff]  ;;  %v2074_v3 = vpack.c.bf16 %v54_v1, %v53_v0 }
   0x3   :  { %1934 = vmatprep.mubr.msk.f32.mxu0 %vm62_vm0, %v45_v2 }
   0x4   :  { %18 = vsyncpa [#allocation5], 0  ;;  %2075 = vmatprep.subr.bf16.mxu0 %v2074_v3  ;;  %2142 = vmatprep.subr.bf16.mxu1 %v2074_v3  ;;  %v46_v4 = vld [vmem:[%s2871_s0 + $0x8] sm:$0xff]  ;;  %v559_v5 = vld [vmem:[%s2878_s7] sm:$0xff]  ;;  %v2275_v8 = vmov 0.0|0.0   ;;  %v2276_v13 = vmov 0  }
   0x5   :  { %2077 = vmatpush3.bf16.msra.mxu0 %v2074_v3  ;;  %2143 = vmatpush3.bf16.msra.mxu1 %v2074_v3  ;;  %v560_v6 = vld [vmem:[%s2878_s7 + $0x8] sm:$0xff]  ;;  %v47_v7 = vld [vmem:[%s2871_s0 + $0x10] sm:$0xff]  ;;  %v48_v10 = vld [vmem:[%s2871_s0 + $0x18] sm:$0xff]  ;;  %vm2277_vm1 = vmmov 0   ;;  %v2278_v16 = vmov 0.0   ;;  %vm208_vm2 = vcmask 261120  }
   0x6   :  { %2086 = vmatprep.subr.bf16.mxu0 %v2275_v8  ;;  %v2378_v9 = vpack.c.bf16 %v560_v6, %v559_v5  ;;  %v561_v11 = vld [vmem:[%s2878_s7 + $0x10] sm:$0xff]  ;;  %v562_v12 = vld [vmem:[%s2878_s7 + $0x18] sm:$0xff]  ;;  %2154 = vset.pattern.permute.xlu1 %v2276_v13  ;;  %v193_v14 = vld [vmem:[%s2874_s3 + $0x8] sm:$0xff]  ;;  %s2279_s26 = smov 64   ;;  %vm550_vm3 = vcmask 785408   ;;  %s2280_s15 = smov 96  }
   0x7   :  { %v2395_v15 = vpack.c.bf16 %v562_v12, %v561_v11  ;;  %321 = vperm.xlu1 %2154, %v193_v14   ;;  %v200_v17 = vld [vmem:[%s2875_s4] sm:$0xff]  ;;  %2153 = vset.pattern.permute.xlu0 %v2276_v13  ;;  %v50_v26 = vld [vmem:[%s2871_s0 + $0x28] sm:$0xff]  ;;  %v51_v27 = vld [vmem:[%s2871_s0 + $0x30] sm:$0xff] }
   0x8   :  { %1935 = vmatmul.mubr.msk.f32.vlgmr.msra.gmra.mrb[0].mxu0 %vm62_vm0, %v46_v4  ;;  %v2415_v18 = vld [vmem:[%s2873_s2] ss:$0 sm:$0xff]  ;;  %v52_v28 = vld [vmem:[%s2871_s0 + $0x38] sm:$0xff]  ;;  %v201_v44 = vld [vmem:[%s2875_s4 + $0x8] sm:$0xff] }
   0x9   :  { %1937 = vmatprep.mubr.msk.f32.mxu0 %vm62_vm0, %v47_v7  ;;  %2088 = vmatpush3.bf16.msra.mxu0 %v2378_v9  ;;  %v49_v25 = vld [vmem:[%s2871_s0 + $0x20] sm:$0xff]  ;;  %v411_v50 = vld [vmem:[%s2876_s5 + $0x8] sm:$0xff]  ;;  %v412_v52 = vld [vmem:[%s2876_s5 + $0x10] sm:$0xff] }
   0xa   :  { %2089 = vmatprep.subr.bf16.mxu0 %v2275_v8  ;;  %1940 = vmatprep.mubr.msk.f32.mxu1 %vm62_vm0, %v49_v25  ;;  %v192_v29 = vld [vmem:[%s2874_s3] sm:$0xff]  ;;  %v413_v53 = vld [vmem:[%s2876_s5 + $0x18] sm:$0xff] }
   0xb   :  { %364 = vperm.xlu1 %2154, %v200_v17   ;;  %1941 = vmatmul.mubr.msk.f32.vlgmr.msra.gmra.mrb[0].mxu1 %vm62_vm0, %v50_v26  ;;  %v2448_v45 = vld [vmem:[%s2879_s8] ss:$0 sm:$0xff]  ;;  %v2082_v54 = vpack.c.bf16 %v413_v53, %v412_v52 }
   0xc   :  { %1938 = vmatmul.mubr.msk.f32.gmra.mrb[2].mxu0 %vm62_vm0, %v48_v10  ;;  %1943 = vmatprep.mubr.msk.f32.mxu1 %vm62_vm0, %v51_v27  ;;  %v410_v49 = vld [vmem:[%s2876_s5] sm:$0xff] }
   0xd   :  { %1974 = vmatprep.mubr.msk.f32.mxu0 %vm2277_vm1, %v2278_v16  ;;  %2091 = vmatpush3.bf16.msra.mxu0 %v2395_v15  ;;  %v2078_v51 = vpack.c.bf16 %v411_v50, %v410_v49  ;;  %v2502_v26 = vld [vmem:[%s2877_s6] ss:$0 sm:$0xff] }
   0xe   :  { %2098 = vmatprep.subr.bf16.mxu0 %v2275_v8 }
   0xf   :  { %1944 = vmatmul.mubr.msk.f32.gmra.mrb[2].mxu1 %vm62_vm0, %v52_v28  ;;  %2079 = vmatprep.subr.bf16.mxu1 %v2078_v51 }
  0x10   :  { %1975 = vmatmul.mubr.f32.vlgmr.msra.gmra.mrb[4].mxu0 %v2278_v16  ;;  %2081 = vmatpush3.bf16.msra.mxu1 %v2078_v51 }
  0x11   :  { %2100 = vmatpush3.bf16.msra.mxu0 %v2378_v9  ;;  %1996 = vmatprep.mubr.msk.f32.mxu0 %vm2277_vm1, %v2278_v16 }
  0x12   :  { %2101 = vmatprep.subr.bf16.mxu0 %v2275_v8  ;;  %2083 = vmatprep.subr.bf16.mxu1 %v2082_v54 }
  0x14   :  { %2085 = vmatpush3.bf16.msra.mxu1 %v2082_v54 }
  0x15   :  { %2103 = vmatpush3.bf16.msra.mxu0 %v2395_v15  ;;  %2092 = vmatprep.subr.bf16.mxu1 %v2275_v8 }
  0x16   :  { %2110 = vmatprep.subr.bf16.mxu0 %v2275_v8 }
  0x86   :  { %v322_v3 = vpop.permute.xlu1 %321 }
  0x8a   :  { %v365_v4 = vpop.permute.xlu1 %364 }
  0xdb   :  { %v1936_v19 = vpop.f32.mrb[0].mxu0 }
  0xdc   :  { %v153_v20 = vpop.f32.mrb[1].mxu0  ;;  %v159_v22 = vadd.f32 %v1936_v19, %v2415_v18 }
  0xdd   :  { %v154_v21 = vadd.f32 %v2415_v18, %v153_v20 }
  0xde   :  { %v212_v24 = vsel %vm208_vm2, %v159_v22, 0.0  ;;  %v1942_v57 = vpop.f32.mrb[0].mxu1 }
  0xdf   :  { %v209_v23 = vsel %vm208_vm2, %v154_v21, 0.0  ;;  %v1939_v30 = vpop.f32.mrb[2].mxu0  ;;  %v173_v58 = vpop.f32.mrb[1].mxu1  ;;  %v2479_v59 = vadd.f32 %v1942_v57, %v2415_v18 }
  0xe0   :  { %210 = vadd.xlane.f32.xlu0 %v209_v23  ;;  %v163_v31 = vpop.f32.mrb[3].mxu0  ;;  %v2454_v47 = vadd.f32 %v1939_v30, %v2415_v18  ;;  %v2482_v60 = vadd.f32 %v2415_v18, %v173_v58 }
  0xe1   :  { %v2474_v55 = vadd.f32 %v2415_v18, %v163_v31  ;;  %v224_v1 = vsel %vm208_vm2, %v2479_v59, 0.0 }
  0xe2   :  { %v218_v48 = vsel %vm208_vm2, %v2454_v47, 0.0  ;;  %v221_v61 = vsel %vm208_vm2, %v2482_v60, 0.0  ;;  %v1945_v62 = vpop.f32.mrb[2].mxu1 }
  0xe3   :  { %v640_v32 = vpop.f32.mrb[4].mxu0  ;;  %v215_v56 = vsel %vm208_vm2, %v2474_v55, 0.0  ;;  %v183_v63 = vpop.f32.mrb[3].mxu1 }
  0xe4   :  { %213 = vadd.xlane.f32.xlu0 %v212_v24  ;;  %v1976_v33 = vpop.f32.mrb[5].mxu0  ;;  %v2451_v46 = vadd.f32 %v2448_v45, %v640_v32  ;;  %v2487_v0 = vadd.f32 %v2415_v18, %v183_v63 }
  0xe6   :  { %v227_v2 = vsel %vm208_vm2, %v2487_v0, 0.0 }
  0xfa   :  { %316 = vperm.xlu0 %2153, %v192_v29  }
 0x119   :  { %219 = vadd.xlane.f32.xlu0 %v218_v48 }
 0x11d   :  { %228 = vadd.xlane.f32.xlu0 %v227_v2 }
 0x16d   :  { %v211_v34 = vpop.xlane.xlu0 %210 }
 0x16e   :  { %v234_v35 = vmul.f32 0.03125, %v211_v34 }
 0x170   :  { %v242_v38 = vsub.f32 %v154_v21, %v234_v35 }
 0x171   :  { %v214_v36 = vpop.xlane.xlu0 %213 }
 0x172   :  { %v235_v37 = vmul.f32 0.03125, %v214_v36  ;;  %v250_v42 = vmul.f32 %v242_v38, %v242_v38 }
 0x174   :  { %v243_v39 = vsub.f32 %v159_v22, %v235_v37  ;;  %v258_v43 = vsel %vm208_vm2, %v250_v42, 0.0 }
 0x176   :  { %v251_v40 = vmul.f32 %v243_v39, %v243_v39 }
 0x178   :  { %v261_v41 = vsel %vm208_vm2, %v251_v40, 0.0 }
 0x179   :  { %262 = vadd.xlane.f32.xlu1 %v261_v41  ;;  %v317_v19 = vpop.permute.xlu0 %316 }
 0x17d   :  { %259 = vadd.xlane.f32.xlu1 %v258_v43  ;;  %v189_v43 = vadd.f32 %v1945_v62, %v2415_v18 }
 0x17f   :  { %v230_v50 = vsel %vm208_vm2, %v189_v43, 0.0 }
 0x18e   :  { %369 = vperm.xlu1 %2154, %v201_v44  }
 0x192   :  { %652 = vrot.lane.b32.xlu1 %v2451_v46, %s2279_s26 }
 0x1a6   :  { %v220_v41 = vpop.xlane.xlu0 %219 }
 0x1b6   :  { %216 = vadd.xlane.f32.xlu1 %v215_v56  ;;  %v229_v56 = vpop.xlane.xlu0 %228 }
 0x1b7   :  { %v240_v57 = vmul.f32 0.03125, %v229_v56 }
 0x1ba   :  { %222 = vadd.xlane.f32.xlu1 %v221_v61 }
 0x1be   :  { %225 = vadd.xlane.f32.xlu1 %v224_v1 }
 0x206   :  { %v263_v5 = vpop.xlane.xlu1 %262 }
 0x207   :  { %v283_v6 = vmul.f32 0.03125, %v263_v5  ;;  %v203_v5 = vld [vmem:[%s2875_s4 + $0x18] sm:$0xff] }
 0x209   :  { %v291_v7 = vadd.f32 1e-05, %v283_v6  ;;  %v196_v6 = vld [vmem:[%s2874_s3 + $0x20] sm:$0xff] }
 0x20a   :  { %v260_v10 = vpop.xlane.xlu1 %259 }
 0x20b   :  { %2155 = vrsqrt.f32 %v291_v7  ;;  %v282_v11 = vmul.f32 0.03125, %v260_v10  ;;  %v204_v7 = vld [vmem:[%s2875_s4 + $0x20] sm:$0xff]  ;;  %v205_v10 = vld [vmem:[%s2875_s4 + $0x28] sm:$0xff] }
 0x20d   :  { %v290_v12 = vadd.f32 1e-05, %v282_v11  ;;  %v198_v11 = vld [vmem:[%s2874_s3 + $0x30] sm:$0xff] }
 0x20e   :  { %v370_v23 = vpop.permute.xlu1 %369 }
 0x20f   :  { %2157 = vrsqrt.f32 %v290_v12  ;;  %v199_v12 = vld [vmem:[%s2874_s3 + $0x38] sm:$0xff] }
 0x212   :  { %v653_v37 = vpop.permute.xlu1 %652 }
 0x215   :  { %v2156_v13 = vpop.eup %2155 }
 0x216   :  { %v307_v14 = vmul.f32 %v2156_v13, %v243_v39  ;;  %v206_v13 = vld [vmem:[%s2875_s4 + $0x30] sm:$0xff] }
 0x218   :  { %v355_v21 = vmul.f32 %v322_v3, %v307_v14  ;;  %v195_v3 = vld [vmem:[%s2874_s3 + $0x18] sm:$0xff] }
 0x219   :  { %v2158_v17 = vpop.eup %2157 }
 0x21a   :  { %v306_v20 = vmul.f32 %v2158_v17, %v242_v38  ;;  %v403_v25 = vadd.f32 %v370_v23, %v355_v21 }
 0x21c   :  { %v354_v22 = vmul.f32 %v317_v19, %v306_v20 }
 0x21e   :  { %v402_v24 = vadd.f32 %v365_v4, %v354_v22  ;;  %v202_v4 = vld [vmem:[%s2875_s4 + $0x10] sm:$0xff] }
 0x220   :  { %1954 = vmatprep.mubr.msk.f32.mxu1 %vm208_vm2, %v402_v24 }
 0x221   :  { %1955 = vmatmul.mubr.msk.f32.vlgmr.msra.gmra.mrb[4].mxu1 %vm208_vm2, %v403_v25 }
 0x222   :  { %2094 = vmatpush3.bf16.msra.mxu1 %v2378_v9 }
 0x223   :  { %2095 = vmatprep.subr.bf16.mxu1 %v2275_v8 }
 0x226   :  { %2097 = vmatpush3.bf16.msra.mxu1 %v2395_v15 }
 0x227   :  { %2104 = vmatprep.subr.bf16.mxu1 %v2275_v8 }
 0x243   :  { %v217_v39 = vpop.xlane.xlu1 %216 }
 0x244   :  { %v236_v40 = vmul.f32 0.03125, %v217_v39 }
 0x246   :  { %v2518_v44 = vsub.f32 %v2474_v55, %v236_v40  ;;  %v197_v40 = vld [vmem:[%s2874_s3 + $0x28] sm:$0xff] }
 0x247   :  { %v223_v42 = vpop.xlane.xlu1 %222 }
 0x248   :  { %v238_v49 = vmul.f32 0.03125, %v223_v42  ;;  %v252_v51 = vmul.f32 %v2518_v44, %v2518_v44 }
 0x24a   :  { %v2527_v53 = vsub.f32 %v2482_v60, %v238_v49  ;;  %v264_v18 = vsel %vm208_vm2, %v252_v51, 0.0  ;;  %v2539_v60 = vsub.f32 %v2487_v0, %v240_v57  ;;  %v194_v0 = vld [vmem:[%s2874_s3 + $0x10] sm:$0xff]  ;;  %v207_v49 = vld [vmem:[%s2875_s4 + $0x38] sm:$0xff] }
 0x24b   :  { %v226_v52 = vpop.xlane.xlu1 %225 }
 0x24c   :  { %v239_v54 = vmul.f32 0.03125, %v226_v52  ;;  %v254_v61 = vmul.f32 %v2527_v53, %v2527_v53 }
 0x24e   :  { %v270_v62 = vsel %vm208_vm2, %v254_v61, 0.0 }
 0x2f4   :  { %v1956_v27 = vpop.f32.mrb[4].mxu1 }
 0x2f5   :  { %v517_v28 = vadd.f32 %v1956_v27, %v2502_v26  ;;  %v511_v29 = vpop.f32.mrb[5].mxu1 }
 0x2f6   :  { %v512_v30 = vadd.f32 %v2502_v26, %v511_v29 }
 0x2f7   :  { %552 = vst.msk [vmem:[#allocation2 + $0x8] sm:$0xff] %vm550_vm3, %v517_v28 }
 0x2f8   :  { %551 = vst.msk [vmem:[#allocation2] sm:$0xff] %vm550_vm3, %v512_v30 }
 0x2ff   :  { %v2508_v31 = vld [vmem:[#allocation2] sm:$0xff] }
 0x300   :  { %v644_v32 = vadd.f32 %v2451_v46, %v2508_v31  ;;  %v237_v46 = vmul.f32 0.03125, %v220_v41 }
 0x302   :  { %v1832_v33 = vmul.f32 -1.442695, %v644_v32  ;;  %v2521_v48 = vsub.f32 %v2454_v47, %v237_v46  ;;  %v2533_v47 = vsub.f32 %v2479_v59, %v239_v54  ;;  %v256_v59 = vmul.f32 %v2539_v60, %v2539_v60 }
 0x304   :  { %2159 = vpow2.f32 %v1832_v33  ;;  %v253_v55 = vmul.f32 %v2521_v48, %v2521_v48  ;;  %v255_v63 = vmul.f32 %v2533_v47, %v2533_v47  ;;  %v276_v2 = vsel %vm208_vm2, %v256_v59, 0.0 }
 0x306   :  { %v267_v58 = vsel %vm208_vm2, %v253_v55, 0.0  ;;  %v273_v1 = vsel %vm208_vm2, %v255_v63, 0.0 }
 0x30e   :  { %v2160_v34 = vpop.eup %2159 }
 0x30f   :  { %v648_v35 = vadd.f32 1.0, %v2160_v34 }
 0x311   :  { %2161 = vrcp.f32 %v648_v35 }
 0x31b   :  { %v2512_v36 = vpop.eup %2161 }
 0x31c   :  { %v655_v38 = vmul.f32 %v2512_v36, %v653_v37 }
 0x31e   :  { %657 = vrot.lane.b32.xlu1 %v655_v38, %s2279_s26 }
 0x342   :  { %231 = vadd.xlane.f32.xlu1 %v230_v50 }
 0x346   :  { %265 = vadd.xlane.f32.xlu1 %v264_v18 }
 0x34a   :  { %268 = vadd.xlane.f32.xlu1 %v267_v58 }
 0x34e   :  { %271 = vadd.xlane.f32.xlu1 %v270_v62 }
 0x352   :  { %274 = vadd.xlane.f32.xlu1 %v273_v1  ;;  %v668_v1 = vmul.f32 0.0, %v2512_v36 }
 0x356   :  { %277 = vadd.xlane.f32.xlu1 %v276_v2 }
 0x367   :  { %326 = vperm.xlu1 %2154, %v194_v0  }
 0x36b   :  { %331 = vperm.xlu1 %2154, %v195_v3  }
 0x36f   :  { %374 = vperm.xlu1 %2154, %v202_v4  }
 0x373   :  { %379 = vperm.xlu1 %2154, %v203_v5  }
 0x377   :  { %336 = vperm.xlu1 %2154, %v196_v6  }
 0x37b   :  { %384 = vperm.xlu1 %2154, %v204_v7  }
 0x37f   :  { %389 = vperm.xlu1 %2154, %v205_v10  }
 0x383   :  { %346 = vperm.xlu1 %2154, %v198_v11  }
 0x387   :  { %351 = vperm.xlu1 %2154, %v199_v12  }
 0x38b   :  { %394 = vperm.xlu1 %2154, %v206_v13  }
 0x390   :  { %v658_v14 = vpop.permute.xlu1 %657 }
 0x391   :  { %v660_v17 = vadd.f32 %v658_v14, %v2508_v31 }
 0x393   :  { %2163 = vtanh.f32 %v660_v17 }
 0x39d   :  { %v2164_v19 = vpop.eup %2163 }
 0x39e   :  { %664 = vrot.lane.b32.xlu0 %v2164_v19, %s2280_s15 }
 0x3cf   :  { %v232_v20 = vpop.xlane.xlu1 %231 }
 0x3d0   :  { %v241_v21 = vmul.f32 0.03125, %v232_v20 }
 0x3d2   :  { %v2580_v22 = vsub.f32 %v189_v43, %v241_v21 }
 0x3d3   :  { %v266_v23 = vpop.xlane.xlu1 %265 }
 0x3d4   :  { %v257_v24 = vmul.f32 %v2580_v22, %v2580_v22  ;;  %v284_v27 = vmul.f32 0.03125, %v266_v23 }
 0x3d6   :  { %v279_v25 = vsel %vm208_vm2, %v257_v24, 0.0  ;;  %v292_v29 = vadd.f32 1e-05, %v284_v27 }
 0x3d7   :  { %280 = vadd.xlane.f32.xlu0 %v279_v25  ;;  %v269_v28 = vpop.xlane.xlu1 %268 }
 0x3d8   :  { %v285_v30 = vmul.f32 0.03125, %v269_v28  ;;  %2165 = vrsqrt.f32 %v292_v29 }
 0x3da   :  { %v293_v32 = vadd.f32 1e-05, %v285_v30 }
 0x3db   :  { %v272_v31 = vpop.xlane.xlu1 %271 }
 0x3dc   :  { %2167 = vrsqrt.f32 %v293_v32  ;;  %v286_v34 = vmul.f32 0.03125, %v272_v31 }
 0x3de   :  { %v294_v37 = vadd.f32 1e-05, %v286_v34 }
 0x3df   :  { %v275_v33 = vpop.xlane.xlu1 %274 }
 0x3e0   :  { %2169 = vrsqrt.f32 %v294_v37  ;;  %v287_v0 = vmul.f32 0.03125, %v275_v33 }
 0x3e2   :  { %v2166_v39 = vpop.eup %2165  ;;  %v295_v4 = vadd.f32 1e-05, %v287_v0 }
 0x3e3   :  { %v278_v35 = vpop.xlane.xlu1 %277  ;;  %v308_v42 = vmul.f32 %v2166_v39, %v2518_v44 }
 0x3e4   :  { %v288_v3 = vmul.f32 0.03125, %v278_v35  ;;  %2171 = vrsqrt.f32 %v295_v4 }
 0x3e6   :  { %v2168_v43 = vpop.eup %2167 }
 0x3e7   :  { %v327_v38 = vpop.permute.xlu1 %326  ;;  %v309_v51 = vmul.f32 %v2168_v43, %v2521_v48  ;;  %v662_v48 = vsub.f32 1.0, %v2512_v36 }
 0x3e8   :  { %v356_v46 = vmul.f32 %v327_v38, %v308_v42 }
 0x3ea   :  { %v2170_v56 = vpop.eup %2169 }
 0x3eb   :  { %v332_v41 = vpop.permute.xlu1 %331  ;;  %v310_v57 = vmul.f32 %v2170_v56, %v2527_v53  ;;  %v296_v53 = vadd.f32 1e-05, %v288_v3 }
 0x3ec   :  { %v357_v54 = vmul.f32 %v332_v41, %v309_v51 }
 0x3ed   :  { %341 = vperm.xlu0 %2153, %v197_v40   ;;  %2173 = vrsqrt.f32 %v296_v53 }
 0x3ee   :  { %v2172_v13 = vpop.eup %2171 }
 0x3ef   :  { %v375_v50 = vpop.permute.xlu1 %374  ;;  %v311_v14 = vmul.f32 %v2172_v13, %v2533_v47 }
 0x3f0   :  { %v404_v52 = vadd.f32 %v375_v50, %v356_v46  ;;  %v676_v50 = vld [vmem:[#allocation2 + $0x8] sm:$0xff] }
 0x3f1   :  { %399 = vperm.xlu0 %2153, %v207_v49  }
 0x3f2   :  { %1957 = vmatprep.mubr.msk.f32.mxu1 %vm208_vm2, %v404_v52 }
 0x3f3   :  { %v380_v18 = vpop.permute.xlu1 %379 }
 0x3f4   :  { %v405_v55 = vadd.f32 %v380_v18, %v357_v54 }
 0x3f6   :  { %1958 = vmatmul.mubr.msk.f32.gmra.mrb[6].mxu1 %vm208_vm2, %v405_v55 }
 0x3f7   :  { %v337_v44 = vpop.permute.xlu1 %336  ;;  %v2174_v36 = vpop.eup %2173 }
 0x3f8   :  { %v358_v58 = vmul.f32 %v337_v44, %v310_v57  ;;  %v312_v17 = vmul.f32 %v2174_v36, %v2539_v60 }
 0x3fb   :  { %v385_v61 = vpop.permute.xlu1 %384 }
 0x3fc   :  { %v406_v62 = vadd.f32 %v385_v61, %v358_v58 }
 0x3fe   :  { %1960 = vmatprep.mubr.msk.f32.mxu1 %vm208_vm2, %v406_v62 }
 0x3ff   :  { %v390_v5 = vpop.permute.xlu1 %389 }
 0x403   :  { %v347_v6 = vpop.permute.xlu1 %346 }
 0x404   :  { %v360_v23 = vmul.f32 %v347_v6, %v312_v17 }
 0x407   :  { %v352_v11 = vpop.permute.xlu1 %351 }
 0x40b   :  { %v395_v20 = vpop.permute.xlu1 %394 }
 0x40c   :  { %v408_v25 = vadd.f32 %v395_v20, %v360_v23 }
 0x410   :  { %v665_v63 = vpop.permute.xlu0 %664 }
 0x411   :  { %v667_v59 = vmul.f32 %v665_v63, %v662_v48 }
 0x413   :  { %v2599_v2 = vadd.f32 %v668_v1, %v667_v59 }
 0x415   :  { %671 = vrot.lane.b32.xlu1 %v2599_v2, %s2280_s15 }
 0x464   :  { %v281_v7 = vpop.xlane.xlu0 %280 }
 0x465   :  { %v289_v10 = vmul.f32 0.03125, %v281_v7 }
 0x467   :  { %v297_v12 = vadd.f32 1e-05, %v289_v10 }
 0x469   :  { %2175 = vrsqrt.f32 %v297_v12 }
 0x46c   :  { %v342_v19 = vpop.permute.xlu0 %341 }
 0x46d   :  { %v359_v21 = vmul.f32 %v342_v19, %v311_v14 }
 0x46f   :  { %v407_v24 = vadd.f32 %v390_v5, %v359_v21 }
 0x470   :  { %v400_v30 = vpop.permute.xlu0 %399 }
 0x471   :  { %1961 = vmatmul.mubr.msk.f32.gmra.mrb[8].mxu1 %vm208_vm2, %v407_v24 }
 0x472   :  { %1963 = vmatprep.mubr.msk.f32.mxu1 %vm208_vm2, %v408_v25 }
 0x473   :  { %v2176_v27 = vpop.eup %2175 }
 0x474   :  { %v313_v28 = vmul.f32 %v2176_v27, %v2580_v22 }
 0x476   :  { %v361_v29 = vmul.f32 %v352_v11, %v313_v28 }
 0x478   :  { %v409_v31 = vadd.f32 %v400_v30, %v361_v29 }
 0x47a   :  { %1964 = vmatmul.mubr.msk.f32.gmra.mrb[10].mxu1 %vm208_vm2, %v409_v31 }
 0x47b   :  { %1985 = vmatprep.mubr.msk.f32.mxu1 %vm2277_vm1, %v2278_v16 }
 0x487   :  { %v672_v47 = vpop.permute.xlu1 %671 }
 0x488   :  { %674 = vst.msk [vmem:[#allocation3] sm:$0xff] %vm208_vm2, %v672_v47  ;;  %1986 = vmatmul.mubr.msk.f32.vlgmr.msra.gmra.mrb[12].mxu1 %vm208_vm2, %v672_v47 }
 0x489   :  { %2106 = vmatpush3.bf16.msra.mxu1 %v2378_v9  ;;  %2007 = vmatprep.mubr.msk.f32.mxu1 %vm2277_vm1, %v2278_v16 }
 0x48a   :  { %2107 = vmatprep.subr.bf16.mxu1 %v2275_v8 }
 0x48d   :  { %2109 = vmatpush3.bf16.msra.mxu1 %v2395_v15 }
 0x48e   :  { %2116 = vmatprep.subr.bf16.mxu1 %v2275_v8 }
 0x4c9   :  { %v1959_v60 = vpop.f32.mrb[6].mxu1 }
 0x4ca   :  { %v527_v22 = vadd.f32 %v1959_v60, %v2502_v26  ;;  %v521_v32 = vpop.f32.mrb[7].mxu1 }
 0x4cb   :  { %v522_v33 = vadd.f32 %v2502_v26, %v521_v32 }
 0x4cc   :  { %554 = vst.msk [vmem:[#allocation2 + $0x18] sm:$0xff] %vm550_vm3, %v527_v22 }
 0x4cd   :  { %553 = vst.msk [vmem:[#allocation2 + $0x10] sm:$0xff] %vm550_vm3, %v522_v33 }
 0x4d3   :  { %v888_v29 = vld [vmem:[#allocation2 + $0x18] sm:$0xff] }
 0x4d4   :  { %v782_v4 = vld [vmem:[#allocation2 + $0x10] sm:$0xff] }
 0x544   :  { %v1962_v34 = vpop.f32.mrb[8].mxu1 }
 0x545   :  { %v537_v35 = vadd.f32 %v1962_v34, %v2502_v26  ;;  %v531_v37 = vpop.f32.mrb[9].mxu1 }
 0x546   :  { %v532_v38 = vadd.f32 %v2502_v26, %v531_v37 }
 0x547   :  { %556 = vst.msk [vmem:[#allocation2 + $0x28] sm:$0xff] %vm550_vm3, %v537_v35 }
 0x548   :  { %555 = vst.msk [vmem:[#allocation2 + $0x20] sm:$0xff] %vm550_vm3, %v532_v38 }
 0x54d   :  { %v1965_v39 = vpop.f32.mrb[10].mxu1 }
 0x54e   :  { %v547_v40 = vadd.f32 %v1965_v39, %v2502_v26  ;;  %v541_v41 = vpop.f32.mrb[11].mxu1 }
 0x54f   :  { %v542_v42 = vadd.f32 %v2502_v26, %v541_v41 }
 0x550   :  { %558 = vst.msk [vmem:[#allocation2 + $0x38] sm:$0xff] %vm550_vm3, %v547_v40 }
 0x551   :  { %557 = vst.msk [vmem:[#allocation2 + $0x30] sm:$0xff] %vm550_vm3, %v542_v42 }
 0x55b   :  { %v745_v43 = vpop.f32.mrb[12].mxu1 }
 0x55c   :  { %v746_v46 = vadd.f32 %v2448_v45, %v745_v43  ;;  %v1987_v49 = vpop.f32.mrb[13].mxu1 }
 0x55e   :  { %757 = vrot.lane.b32.xlu0 %v746_v46, %s2279_s26  ;;  %v749_v51 = vadd.f32 %v746_v46, %v676_v50 }
 0x560   :  { %v1834_v52 = vmul.f32 -1.442695, %v749_v51  ;;  %v994_v51 = vld [vmem:[#allocation2 + $0x20] sm:$0xff] }
 0x562   :  { %2177 = vpow2.f32 %v1834_v52 }
 0x56c   :  { %v2178_v54 = vpop.eup %2177 }
 0x56d   :  { %v753_v18 = vadd.f32 1.0, %v2178_v54 }
 0x56f   :  { %2179 = vrcp.f32 %v753_v18 }
 0x579   :  { %v2180_v55 = vpop.eup %2179 }
 0x57a   :  { %v767_v61 = vsub.f32 1.0, %v2180_v55  ;;  %v773_v48 = vmul.f32 %v2180_v55, %v2599_v2 }
 0x5d0   :  { %v758_v56 = vpop.permute.xlu0 %757 }
 0x5d1   :  { %v760_v26 = vmul.f32 %v2180_v55, %v758_v56 }
 0x5d3   :  { %762 = vrot.lane.b32.xlu1 %v760_v26, %s2279_s26 }
 0x645   :  { %v763_v44 = vpop.permute.xlu1 %762 }
 0x646   :  { %v765_v57 = vadd.f32 %v763_v44, %v676_v50 }
 0x648   :  { %2181 = vtanh.f32 %v765_v57 }
 0x652   :  { %v2182_v58 = vpop.eup %2181 }
 0x653   :  { %769 = vrot.lane.b32.xlu0 %v2182_v58, %s2280_s15 }
 0x6c5   :  { %v770_v62 = vpop.permute.xlu0 %769 }
 0x6c6   :  { %v772_v63 = vmul.f32 %v770_v62, %v767_v61 }
 0x6c8   :  { %v774_v1 = vadd.f32 %v773_v48, %v772_v63 }
 0x6ca   :  { %776 = vrot.lane.b32.xlu1 %v774_v1, %s2280_s15 }
 0x73c   :  { %v777_v59 = vpop.permute.xlu1 %776 }
 0x73d   :  { %780 = vst.msk [vmem:[#allocation3 + $0x8] sm:$0xff] %vm208_vm2, %v777_v59  ;;  %1997 = vmatmul.mubr.msk.f32.vlgmr.msra.gmra.mrb[6].mxu0 %vm208_vm2, %v777_v59 }
 0x73e   :  { %2112 = vmatpush3.bf16.msra.mxu0 %v2378_v9  ;;  %2018 = vmatprep.mubr.msk.f32.mxu0 %vm2277_vm1, %v2278_v16 }
 0x73f   :  { %2113 = vmatprep.subr.bf16.mxu0 %v2275_v8 }
 0x742   :  { %2115 = vmatpush3.bf16.msra.mxu0 %v2395_v15 }
 0x743   :  { %2122 = vmatprep.subr.bf16.mxu0 %v2275_v8 }
 0x810   :  { %v851_v2 = vpop.f32.mrb[6].mxu0 }
 0x811   :  { %v852_v0 = vadd.f32 %v2448_v45, %v851_v2  ;;  %v1998_v3 = vpop.f32.mrb[7].mxu0 }
 0x813   :  { %863 = vrot.lane.b32.xlu0 %v852_v0, %s2279_s26  ;;  %v855_v53 = vadd.f32 %v852_v0, %v782_v4 }
 0x815   :  { %v1836_v5 = vmul.f32 -1.442695, %v855_v53  ;;  %v1100_v53 = vld [vmem:[#allocation2 + $0x28] sm:$0xff] }
 0x817   :  { %2183 = vpow2.f32 %v1836_v5 }
 0x821   :  { %v2184_v6 = vpop.eup %2183 }
 0x822   :  { %v859_v7 = vadd.f32 1.0, %v2184_v6 }
 0x824   :  { %2185 = vrcp.f32 %v859_v7 }
 0x82e   :  { %v2186_v10 = vpop.eup %2185 }
 0x82f   :  { %v873_v17 = vsub.f32 1.0, %v2186_v10  ;;  %v879_v20 = vmul.f32 %v2186_v10, %v774_v1 }
 0x885   :  { %v864_v11 = vpop.permute.xlu0 %863 }
 0x886   :  { %v866_v12 = vmul.f32 %v2186_v10, %v864_v11 }
 0x888   :  { %868 = vrot.lane.b32.xlu1 %v866_v12, %s2279_s26  ;;  %v1425_v12 = vld [vmem:[%s2880_s9] sm:$0xff] }
 0x8fa   :  { %v869_v13 = vpop.permute.xlu1 %868 }
 0x8fb   :  { %v871_v36 = vadd.f32 %v869_v13, %v782_v4  ;;  %v1426_v13 = vld [vmem:[%s2880_s9 + $0x8] sm:$0xff] }
 0x8fd   :  { %2187 = vtanh.f32 %v871_v36  ;;  %v2134_v36 = vpack.c.bf16 %v1426_v13, %v1425_v12 }
 0x907   :  { %v2188_v14 = vpop.eup %2187 }
 0x908   :  { %875 = vrot.lane.b32.xlu0 %v2188_v14, %s2280_s15 }
 0x97a   :  { %v876_v19 = vpop.permute.xlu0 %875 }
 0x97b   :  { %v878_v21 = vmul.f32 %v876_v19, %v873_v17 }
 0x97d   :  { %v880_v23 = vadd.f32 %v879_v20, %v878_v21 }
 0x97f   :  { %882 = vrot.lane.b32.xlu1 %v880_v23, %s2280_s15 }
 0x9f1   :  { %v883_v24 = vpop.permute.xlu1 %882 }
 0x9f2   :  { %886 = vst.msk [vmem:[#allocation3 + $0x10] sm:$0xff] %vm208_vm2, %v883_v24  ;;  %2008 = vmatmul.mubr.msk.f32.vlgmr.msra.gmra.mrb[14].mxu1 %vm208_vm2, %v883_v24  ;;  %v1427_v24 = vld [vmem:[%s2880_s9 + $0x10] sm:$0xff] }
 0x9f3   :  { %2118 = vmatpush3.bf16.msra.mxu1 %v2378_v9  ;;  %2029 = vmatprep.mubr.msk.f32.mxu1 %vm2277_vm1, %v2278_v16 }
 0x9f4   :  { %2119 = vmatprep.subr.bf16.mxu1 %v2275_v8 }
 0x9f7   :  { %2121 = vmatpush3.bf16.msra.mxu1 %v2395_v15 }
 0x9f8   :  { %2128 = vmatprep.subr.bf16.mxu1 %v2275_v8 }
 0xac5   :  { %v957_v25 = vpop.f32.mrb[14].mxu1 }
 0xac6   :  { %v958_v27 = vadd.f32 %v2448_v45, %v957_v25  ;;  %v2009_v28 = vpop.f32.mrb[15].mxu1  ;;  %v1428_v25 = vld [vmem:[%s2880_s9 + $0x18] sm:$0xff] }
 0xac8   :  { %969 = vrot.lane.b32.xlu0 %v958_v27, %s2279_s26  ;;  %v961_v30 = vadd.f32 %v958_v27, %v888_v29  ;;  %v2138_v27 = vpack.c.bf16 %v1428_v25, %v1427_v24 }
 0xaca   :  { %v1838_v31 = vmul.f32 -1.442695, %v961_v30  ;;  %v1418_v30 = vld [vmem:[#allocation3 + $0x8] sm:$0xff] }
 0xacc   :  { %2189 = vpow2.f32 %v1838_v31  ;;  %v1419_v31 = vld [vmem:[#allocation3 + $0x10] sm:$0xff] }
 0xad6   :  { %v2190_v47 = vpop.eup %2189 }
 0xad7   :  { %v965_v60 = vadd.f32 1.0, %v2190_v47 }
 0xad9   :  { %2191 = vrcp.f32 %v965_v60 }
 0xae3   :  { %v2192_v22 = vpop.eup %2191 }
 0xae4   :  { %v979_v38 = vsub.f32 1.0, %v2192_v22  ;;  %v985_v40 = vmul.f32 %v2192_v22, %v880_v23 }
 0xb3a   :  { %v970_v32 = vpop.permute.xlu0 %969 }
 0xb3b   :  { %v972_v33 = vmul.f32 %v2192_v22, %v970_v32 }
 0xb3d   :  { %974 = vrot.lane.b32.xlu1 %v972_v33, %s2279_s26 }
 0xbaf   :  { %v975_v34 = vpop.permute.xlu1 %974 }
 0xbb0   :  { %v977_v35 = vadd.f32 %v975_v34, %v888_v29  ;;  %v1417_v29 = vld [vmem:[#allocation3] sm:$0xff] }
 0xbb2   :  { %2193 = vtanh.f32 %v977_v35 }
 0xbbc   :  { %v2194_v37 = vpop.eup %2193 }
 0xbbd   :  { %981 = vrot.lane.b32.xlu0 %v2194_v37, %s2280_s15 }
 0xc2f   :  { %v982_v39 = vpop.permute.xlu0 %981 }
 0xc30   :  { %v984_v41 = vmul.f32 %v982_v39, %v979_v38 }
 0xc32   :  { %v986_v42 = vadd.f32 %v985_v40, %v984_v41 }
 0xc34   :  { %988 = vrot.lane.b32.xlu1 %v986_v42, %s2280_s15 }
 0xca6   :  { %v989_v43 = vpop.permute.xlu1 %988 }
 0xca7   :  { %992 = vst.msk [vmem:[#allocation3 + $0x18] sm:$0xff] %vm208_vm2, %v989_v43  ;;  %2019 = vmatmul.mubr.msk.f32.vlgmr.msra.gmra.mrb[8].mxu0 %vm208_vm2, %v989_v43 }
 0xca8   :  { %2124 = vmatpush3.bf16.msra.mxu0 %v2378_v9  ;;  %2040 = vmatprep.mubr.msk.f32.mxu0 %vm2277_vm1, %v2278_v16 }
 0xca9   :  { %2125 = vmatprep.subr.bf16.mxu0 %v2275_v8 }
 0xcac   :  { %2127 = vmatpush3.bf16.msra.mxu0 %v2395_v15 }
 0xcad   :  { %2135 = vmatprep.subr.bf16.mxu0 %v2134_v36 }
 0xcae   :  { %v1420_v47 = vld [vmem:[#allocation3 + $0x18] sm:$0xff] }
 0xd7a   :  { %v1063_v46 = vpop.f32.mrb[8].mxu0 }
 0xd7b   :  { %v1064_v49 = vadd.f32 %v2448_v45, %v1063_v46  ;;  %v2020_v50 = vpop.f32.mrb[9].mxu0 }
 0xd7d   :  { %1075 = vrot.lane.b32.xlu0 %v1064_v49, %s2279_s26  ;;  %v1067_v52 = vadd.f32 %v1064_v49, %v994_v51 }
 0xd7f   :  { %v1840_v54 = vmul.f32 -1.442695, %v1067_v52 }
 0xd81   :  { %2195 = vpow2.f32 %v1840_v54 }
 0xd8b   :  { %v2196_v18 = vpop.eup %2195 }
 0xd8c   :  { %v1071_v55 = vadd.f32 1.0, %v2196_v18 }
 0xd8e   :  { %2197 = vrcp.f32 %v1071_v55 }
 0xd98   :  { %v2198_v56 = vpop.eup %2197 }
 0xd99   :  { %v1085_v62 = vsub.f32 1.0, %v2198_v56  ;;  %v1091_v63 = vmul.f32 %v2198_v56, %v986_v42  ;;  %v1206_v42 = vld [vmem:[#allocation2 + $0x30] sm:$0xff] }
 0xdef   :  { %v1076_v26 = vpop.permute.xlu0 %1075 }
 0xdf0   :  { %v1078_v44 = vmul.f32 %v2198_v56, %v1076_v26 }
 0xdf2   :  { %1080 = vrot.lane.b32.xlu1 %v1078_v44, %s2279_s26 }
 0xe64   :  { %v1081_v57 = vpop.permute.xlu1 %1080 }
 0xe65   :  { %v1083_v58 = vadd.f32 %v1081_v57, %v994_v51 }
 0xe67   :  { %2199 = vtanh.f32 %v1083_v58 }
 0xe71   :  { %v2200_v61 = vpop.eup %2199 }
 0xe72   :  { %1087 = vrot.lane.b32.xlu0 %v2200_v61, %s2280_s15 }
 0xee4   :  { %v1088_v48 = vpop.permute.xlu0 %1087 }
 0xee5   :  { %v1090_v1 = vmul.f32 %v1088_v48, %v1085_v62 }
 0xee7   :  { %v1092_v59 = vadd.f32 %v1091_v63, %v1090_v1 }
 0xee9   :  { %1094 = vrot.lane.b32.xlu1 %v1092_v59, %s2280_s15 }
 0xf5b   :  { %v1095_v2 = vpop.permute.xlu1 %1094 }
 0xf5c   :  { %1098 = vst.msk [vmem:[#allocation3 + $0x20] sm:$0xff] %vm208_vm2, %v1095_v2  ;;  %2030 = vmatmul.mubr.msk.f32.vlgmr.msra.gmra.mrb[16].mxu1 %vm208_vm2, %v1095_v2  ;;  %v1312_v2 = vld [vmem:[#allocation2 + $0x38] sm:$0xff] }
 0xf5d   :  { %2130 = vmatpush3.bf16.msra.mxu1 %v2378_v9  ;;  %2051 = vmatprep.mubr.msk.f32.mxu1 %vm2277_vm1, %v2278_v16 }
 0xf5e   :  { %2131 = vmatprep.subr.bf16.mxu1 %v2275_v8 }
 0xf61   :  { %2133 = vmatpush3.bf16.msra.mxu1 %v2395_v15 }
 0xf63   :  { %v1421_v60 = vld [vmem:[#allocation3 + $0x20] sm:$0xff] }
0x102f   :  { %v1169_v0 = vpop.f32.mrb[16].mxu1 }
0x1030   :  { %v1170_v3 = vadd.f32 %v2448_v45, %v1169_v0  ;;  %v2031_v4 = vpop.f32.mrb[17].mxu1 }
0x1032   :  { %1181 = vrot.lane.b32.xlu0 %v1170_v3, %s2279_s26  ;;  %v1173_v5 = vadd.f32 %v1170_v3, %v1100_v53 }
0x1034   :  { %v1842_v6 = vmul.f32 -1.442695, %v1173_v5 }
0x1036   :  { %2201 = vpow2.f32 %v1842_v6 }
0x1040   :  { %v2202_v7 = vpop.eup %2201 }
0x1041   :  { %v1177_v10 = vadd.f32 1.0, %v2202_v7 }
0x1043   :  { %2203 = vrcp.f32 %v1177_v10 }
0x104d   :  { %v2204_v9 = vpop.eup %2203 }
0x104e   :  { %v1191_v17 = vsub.f32 1.0, %v2204_v9  ;;  %v1197_v20 = vmul.f32 %v2204_v9, %v1092_v59 }
0x10a4   :  { %v1182_v11 = vpop.permute.xlu0 %1181 }
0x10a5   :  { %v1184_v16 = vmul.f32 %v2204_v9, %v1182_v11 }
0x10a7   :  { %1186 = vrot.lane.b32.xlu1 %v1184_v16, %s2279_s26 }
0x1119   :  { %v1187_v8 = vpop.permute.xlu1 %1186 }
0x111a   :  { %v1189_v15 = vadd.f32 %v1187_v8, %v1100_v53 }
0x111c   :  { %2205 = vtanh.f32 %v1189_v15 }
0x1126   :  { %v2206_v14 = vpop.eup %2205 }
0x1127   :  { %1193 = vrot.lane.b32.xlu0 %v2206_v14, %s2280_s15 }
0x1199   :  { %v1194_v19 = vpop.permute.xlu0 %1193 }
0x119a   :  { %v1196_v21 = vmul.f32 %v1194_v19, %v1191_v17 }
0x119c   :  { %v1198_v23 = vadd.f32 %v1197_v20, %v1196_v21 }
0x119e   :  { %1200 = vrot.lane.b32.xlu1 %v1198_v23, %s2280_s15 }
0x1210   :  { %v1201_v28 = vpop.permute.xlu1 %1200 }
0x1211   :  { %1204 = vst.msk [vmem:[#allocation3 + $0x28] sm:$0xff] %vm208_vm2, %v1201_v28  ;;  %2041 = vmatmul.mubr.msk.f32.vlgmr.msra.gmra.mrb[10].mxu0 %vm208_vm2, %v1201_v28 }
0x1212   :  { %2137 = vmatpush3.bf16.msra.mxu0 %v2134_v36  ;;  %2062 = vmatprep.mubr.msk.f32.mxu0 %vm208_vm2, %v1417_v29 }
0x1213   :  { %2139 = vmatprep.subr.bf16.mxu0 %v2138_v27 }
0x1216   :  { %2141 = vmatpush3.bf16.msra.mxu0 %v2138_v27 }
0x1218   :  { %v1422_v22 = vld [vmem:[#allocation3 + $0x28] sm:$0xff] }
0x1219   :  { %2063 = vmatmul.mubr.msk.f32.vlgmr.msra.gmra.mrb[12].mxu0 %vm208_vm2, %v1418_v30 }
0x121a   :  { %2065 = vmatprep.mubr.msk.f32.mxu0 %vm208_vm2, %v1419_v31 }
0x121d   :  { %2066 = vmatmul.mubr.msk.f32.gmra.mrb[14].mxu0 %vm208_vm2, %v1420_v47 }
0x121e   :  { %2068 = vmatprep.mubr.msk.f32.mxu0 %vm208_vm2, %v1421_v60 }
0x1221   :  { %2069 = vmatmul.mubr.msk.f32.gmra.mrb[16].mxu0 %vm208_vm2, %v1422_v22 }
0x12e4   :  { %v1275_v32 = vpop.f32.mrb[10].mxu0 }
0x12e5   :  { %v1276_v33 = vadd.f32 %v2448_v45, %v1275_v32  ;;  %v2042_v34 = vpop.f32.mrb[11].mxu0 }
0x12e7   :  { %1287 = vrot.lane.b32.xlu0 %v1276_v33, %s2279_s26  ;;  %v1279_v43 = vadd.f32 %v1276_v33, %v1206_v42 }
0x12e9   :  { %v1844_v46 = vmul.f32 -1.442695, %v1279_v43 }
0x12eb   :  { %2207 = vpow2.f32 %v1844_v46 }
0x12ec   :  { %v2709_v35 = vpop.f32.mrb[12].mxu0 }
0x12ed   :  { %v1526_v37 = vpop.f32.mrb[13].mxu0 }
0x12f0   :  { %v2067_v38 = vpop.f32.mrb[14].mxu0 }
0x12f1   :  { %v1536_v39 = vpop.f32.mrb[15].mxu0 }
0x12f4   :  { %v2070_v40 = vpop.f32.mrb[16].mxu0 }
0x12f5   :  { %v2711_v41 = vpop.f32.mrb[17].mxu0  ;;  %v2208_v49 = vpop.eup %2207 }
0x12f6   :  { %v1283_v50 = vadd.f32 1.0, %v2208_v49 }
0x12f8   :  { %2209 = vrcp.f32 %v1283_v50 }
0x1302   :  { %v2210_v51 = vpop.eup %2209 }
0x1303   :  { %v1297_v26 = vsub.f32 1.0, %v2210_v51  ;;  %v1303_v57 = vmul.f32 %v2210_v51, %v1198_v23 }
0x1359   :  { %v1288_v52 = vpop.permute.xlu0 %1287 }
0x135a   :  { %v1290_v54 = vmul.f32 %v2210_v51, %v1288_v52 }
0x135c   :  { %1292 = vrot.lane.b32.xlu1 %v1290_v54, %s2279_s26 }
0x13ce   :  { %v1293_v18 = vpop.permute.xlu1 %1292 }
0x13cf   :  { %v1295_v55 = vadd.f32 %v1293_v18, %v1206_v42 }
0x13d1   :  { %2211 = vtanh.f32 %v1295_v55 }
0x13db   :  { %v2212_v56 = vpop.eup %2211 }
0x13dc   :  { %1299 = vrot.lane.b32.xlu0 %v2212_v56, %s2280_s15 }
0x144e   :  { %v1300_v44 = vpop.permute.xlu0 %1299 }
0x144f   :  { %v1302_v58 = vmul.f32 %v1300_v44, %v1297_v26 }
0x1451   :  { %v1304_v61 = vadd.f32 %v1303_v57, %v1302_v58  ;;  %v1565_v57 = vld [vmem:[%s2882_s11] sm:$0xff]  ;;  %v1567_v58 = vld [vmem:[%s2882_s11 + $0x10] sm:$0xff] }
0x1453   :  { %1306 = vrot.lane.b32.xlu1 %v1304_v61, %s2280_s15 }
0x14c5   :  { %v1307_v62 = vpop.permute.xlu1 %1306 }
0x14c6   :  { %1310 = vst.msk [vmem:[#allocation3 + $0x30] sm:$0xff] %vm208_vm2, %v1307_v62  ;;  %2052 = vmatmul.mubr.msk.f32.vlgmr.msra.gmra.mrb[18].mxu1 %vm208_vm2, %v1307_v62 }
0x14cd   :  { %v1423_v48 = vld [vmem:[#allocation3 + $0x30] sm:$0xff] }
0x14ce   :  { %2071 = vmatprep.mubr.msk.f32.mxu0 %vm208_vm2, %v1423_v48 }
0x1599   :  { %v1381_v63 = vpop.f32.mrb[18].mxu1 }
0x159a   :  { %v1382_v1 = vadd.f32 %v2448_v45, %v1381_v63  ;;  %v2053_v59 = vpop.f32.mrb[19].mxu1  ;;  %v2726_v45 = vld [vmem:[%s2881_s10] ss:$0 sm:$0xff] }
0x159b   :  { %v1527_v16 = vadd.f32 %v2726_v45, %v1526_v37  ;;  %v1537_v8 = vadd.f32 %v2726_v45, %v1536_v39  ;;  %v1542_v12 = vadd.f32 %v2067_v38, %v2726_v45  ;;  %v1552_v36 = vadd.f32 %v2070_v40, %v2726_v45 }
0x159c   :  { %1393 = vrot.lane.b32.xlu0 %v1382_v1, %s2279_s26  ;;  %v1385_v0 = vadd.f32 %v1382_v1, %v1312_v2  ;;  %v1532_v25 = vadd.f32 %v2709_v35, %v2726_v45  ;;  %v1547_v27 = vadd.f32 %v2726_v45, %v2711_v41 }
0x159d   :  { %v1581_v15 = vsel %vm208_vm2, %v1527_v16, 0.0  ;;  %v1587_v13 = vsel %vm208_vm2, %v1537_v8, 0.0  ;;  %v1590_v14 = vsel %vm208_vm2, %v1542_v12, 0.0  ;;  %v1596_v17 = vsel %vm208_vm2, %v1552_v36, 0.0 }
0x159e   :  { %v1846_v3 = vmul.f32 -1.442695, %v1385_v0  ;;  %v1584_v28 = vsel %vm208_vm2, %v1532_v25, 0.0  ;;  %v1593_v29 = vsel %vm208_vm2, %v1547_v27, 0.0 }
0x15a0   :  { %2213 = vpow2.f32 %v1846_v3 }
0x15aa   :  { %v2214_v4 = vpop.eup %2213 }
0x15ab   :  { %v1389_v53 = vadd.f32 1.0, %v2214_v4 }
0x15ad   :  { %2215 = vrcp.f32 %v1389_v53 }
0x15b7   :  { %v2216_v5 = vpop.eup %2215 }
0x15b8   :  { %v1403_v19 = vsub.f32 1.0, %v2216_v5  ;;  %v1409_v21 = vmul.f32 %v2216_v5, %v1304_v61  ;;  %v1568_v61 = vld [vmem:[%s2882_s11 + $0x18] sm:$0xff] }
0x160e   :  { %v1394_v6 = vpop.permute.xlu0 %1393 }
0x160f   :  { %v1396_v7 = vmul.f32 %v2216_v5, %v1394_v6  ;;  %v1570_v6 = vld [vmem:[%s2882_s11 + $0x28] sm:$0xff] }
0x1611   :  { %1398 = vrot.lane.b32.xlu1 %v1396_v7, %s2279_s26  ;;  %v1572_v7 = vld [vmem:[%s2882_s11 + $0x38] sm:$0xff] }
0x1683   :  { %v1399_v10 = vpop.permute.xlu1 %1398 }
0x1684   :  { %v1401_v9 = vadd.f32 %v1399_v10, %v1312_v2  ;;  %v1566_v10 = vld [vmem:[%s2882_s11 + $0x8] sm:$0xff] }
0x1686   :  { %2217 = vtanh.f32 %v1401_v9  ;;  %v1574_v9 = vld [vmem:[%s2883_s12 + $0x8] sm:$0xff] }
0x1690   :  { %v2218_v11 = vpop.eup %2217 }
0x1691   :  { %1405 = vrot.lane.b32.xlu0 %v2218_v11, %s2280_s15  ;;  %v1569_v11 = vld [vmem:[%s2882_s11 + $0x20] sm:$0xff] }
0x16b0   :  { %1582 = vadd.xlane.f32.xlu0 %v1581_v15  ;;  %v1573_v15 = vld [vmem:[%s2883_s12] sm:$0xff] }
0x16b4   :  { %1588 = vadd.xlane.f32.xlu0 %v1587_v13  ;;  %v1577_v13 = vld [vmem:[%s2883_s12 + $0x20] sm:$0xff] }
0x16b8   :  { %1591 = vadd.xlane.f32.xlu0 %v1590_v14 }
0x16bc   :  { %1597 = vadd.xlane.f32.xlu0 %v1596_v17 }
0x1703   :  { %v1406_v20 = vpop.permute.xlu0 %1405 }
0x1704   :  { %v1408_v23 = vmul.f32 %v1406_v20, %v1403_v19 }
0x1706   :  { %v1410_v24 = vadd.f32 %v1409_v21, %v1408_v23 }
0x1708   :  { %1412 = vrot.lane.b32.xlu1 %v1410_v24, %s2280_s15 }
0x172c   :  { %1585 = vadd.xlane.f32.xlu1 %v1584_v28 }
0x1730   :  { %1594 = vadd.xlane.f32.xlu1 %v1593_v29 }
0x173d   :  { %v1583_v30 = vpop.xlane.xlu0 %1582 }
0x173e   :  { %v1605_v31 = vmul.f32 0.03125, %v1583_v30 }
0x1740   :  { %v2743_v47 = vsub.f32 %v1527_v16, %v1605_v31  ;;  %v1571_v16 = vld [vmem:[%s2882_s11 + $0x30] sm:$0xff] }
0x1741   :  { %v1589_v60 = vpop.xlane.xlu0 %1588 }
0x1742   :  { %v1607_v22 = vmul.f32 0.03125, %v1589_v60  ;;  %v1621_v32 = vmul.f32 %v2743_v47, %v2743_v47 }
0x1744   :  { %v2747_v33 = vsub.f32 %v1537_v8, %v1607_v22  ;;  %v1629_v34 = vsel %vm208_vm2, %v1621_v32, 0.0  ;;  %v1578_v8 = vld [vmem:[%s2883_s12 + $0x28] sm:$0xff] }
0x1745   :  { %1630 = vadd.xlane.f32.xlu1 %v1629_v34  ;;  %v1592_v40 = vpop.xlane.xlu0 %1591 }
0x1746   :  { %v1623_v35 = vmul.f32 %v2747_v33, %v2747_v33  ;;  %v1608_v41 = vmul.f32 0.03125, %v1592_v40 }
0x1748   :  { %v1635_v37 = vsel %vm208_vm2, %v1623_v35, 0.0  ;;  %v2755_v46 = vsub.f32 %v1542_v12, %v1608_v41  ;;  %v1575_v12 = vld [vmem:[%s2883_s12 + $0x10] sm:$0xff] }
0x1749   :  { %1636 = vadd.xlane.f32.xlu1 %v1635_v37  ;;  %v1598_v62 = vpop.xlane.xlu0 %1597 }
0x174a   :  { %v1624_v55 = vmul.f32 %v2755_v46, %v2755_v46  ;;  %v1610_v48 = vmul.f32 0.03125, %v1598_v62 }
0x174c   :  { %v1638_v44 = vsel %vm208_vm2, %v1624_v55, 0.0  ;;  %v2779_v63 = vsub.f32 %v1552_v36, %v1610_v48 }
0x174e   :  { %v1626_v4 = vmul.f32 %v2779_v63, %v2779_v63 }
0x1750   :  { %v1644_v5 = vsel %vm208_vm2, %v1626_v4, 0.0 }
0x177a   :  { %v1413_v38 = vpop.permute.xlu1 %1412 }
0x177b   :  { %1416 = vst.msk [vmem:[#allocation3 + $0x38] sm:$0xff] %vm208_vm2, %v1413_v38 }
0x1782   :  { %v1424_v39 = vld [vmem:[#allocation3 + $0x38] sm:$0xff] }
0x1783   :  { %2072 = vmatmul.mubr.msk.f32.gmra.mrb[18].mxu0 %vm208_vm2, %v1424_v39 }
0x17b9   :  { %v1586_v42 = vpop.xlane.xlu1 %1585 }
0x17ba   :  { %v1606_v43 = vmul.f32 0.03125, %v1586_v42 }
0x17bc   :  { %v2757_v49 = vsub.f32 %v1532_v25, %v1606_v43 }
0x17bd   :  { %v1595_v50 = vpop.xlane.xlu1 %1594 }
0x17be   :  { %v1609_v51 = vmul.f32 0.03125, %v1595_v50  ;;  %v1622_v52 = vmul.f32 %v2757_v49, %v2757_v49 }
0x17c0   :  { %v2761_v54 = vsub.f32 %v1547_v27, %v1609_v51  ;;  %v1632_v18 = vsel %vm208_vm2, %v1622_v52, 0.0 }
0x17c1   :  { %1633 = vadd.xlane.f32.xlu0 %v1632_v18 }
0x17c2   :  { %v1625_v56 = vmul.f32 %v2761_v54, %v2761_v54 }
0x17c4   :  { %v1641_v26 = vsel %vm208_vm2, %v1625_v56, 0.0 }
0x17c5   :  { %1642 = vadd.xlane.f32.xlu1 %v1641_v26  ;;  %1639 = vadd.xlane.f32.xlu0 %v1638_v44 }
0x17d2   :  { %v1631_v36 = vpop.xlane.xlu1 %1630 }
0x17d3   :  { %v1653_v30 = vmul.f32 0.03125, %v1631_v36 }
0x17d5   :  { %v1661_v35 = vadd.f32 1e-05, %v1653_v30 }
0x17d6   :  { %1687 = vperm.xlu1 %2154, %v1565_v57   ;;  %v1637_v14 = vpop.xlane.xlu1 %1636 }
0x17d7   :  { %v1655_v37 = vmul.f32 0.03125, %v1637_v14 }
0x17d9   :  { %v1663_v18 = vadd.f32 1e-05, %v1655_v37 }
0x17da   :  { %1697 = vperm.xlu1 %2154, %v1567_v58  }
0x17de   :  { %1702 = vperm.xlu1 %2154, %v1568_v61  }
0x184e   :  { %v1634_v19 = vpop.xlane.xlu0 %1633 }
0x184f   :  { %v1654_v23 = vmul.f32 0.03125, %v1634_v19 }
0x1851   :  { %v1662_v27 = vadd.f32 1e-05, %v1654_v23 }
0x1852   :  { %v1643_v17 = vpop.xlane.xlu1 %1642  ;;  %v1640_v21 = vpop.xlane.xlu0 %1639 }
0x1853   :  { %v1656_v24 = vmul.f32 0.03125, %v1640_v21  ;;  %2219 = vrsqrt.f32 %v1662_v27  ;;  %v1657_v55 = vmul.f32 0.03125, %v1643_v17 }
0x1855   :  { %v1664_v28 = vadd.f32 1e-05, %v1656_v24  ;;  %v1665_v58 = vadd.f32 1e-05, %v1657_v55 }
0x1856   :  { %v2073_v1 = vpop.f32.mrb[18].mxu0  ;;  %v1688_v20 = vpop.permute.xlu1 %1687 }
0x1857   :  { %v1562_v59 = vadd.f32 %v2073_v1, %v2726_v45  ;;  %v1556_v2 = vpop.f32.mrb[19].mxu0  ;;  %2221 = vrsqrt.f32 %v1664_v28 }
0x1858   :  { %v1557_v0 = vadd.f32 %v2726_v45, %v1556_v2  ;;  %v1576_v45 = vld [vmem:[%s2883_s12 + $0x18] sm:$0xff]  ;;  %2223 = vrsqrt.f32 %v1661_v35 }
0x1859   :  { %v1602_v3 = vsel %vm208_vm2, %v1562_v59, 0.0 }
0x185a   :  { %1603 = vadd.xlane.f32.xlu0 %v1602_v3  ;;  %v1599_v53 = vsel %vm208_vm2, %v1557_v0, 0.0  ;;  %v2821_v25 = vpop.permute.xlu1 %1697 }
0x185b   :  { %1600 = vadd.xlane.f32.xlu1 %v1599_v53 }
0x185d   :  { %v2220_v52 = vpop.eup %2219 }
0x185e   :  { %1645 = vadd.xlane.f32.xlu0 %v1644_v5  ;;  %v1703_v29 = vpop.permute.xlu1 %1702  ;;  %v1678_v57 = vmul.f32 %v2220_v52, %v2757_v49 }
0x1861   :  { %v2222_v26 = vpop.eup %2221 }
0x1862   :  { %v1680_v61 = vmul.f32 %v2222_v26, %v2755_v46  ;;  %v2224_v4 = vpop.eup %2223 }
0x1864   :  { %v1728_v2 = vmul.f32 %v1703_v29, %v1680_v61 }
0x186c   :  { %1712 = vperm.xlu1 %2154, %v1570_v6  }
0x1870   :  { %1722 = vperm.xlu1 %2154, %v1572_v7   ;;  %v1677_v7 = vmul.f32 %v2224_v4, %v2743_v47  ;;  %v1579_v47 = vld [vmem:[%s2883_s12 + $0x30] sm:$0xff] }
0x1874   :  { %1692 = vperm.xlu0 %2153, %v1566_v10   ;;  %1740 = vperm.xlu1 %2154, %v1574_v9   ;;  %v1725_v9 = vmul.f32 %v1688_v20, %v1677_v7 }
0x1878   :  { %1707 = vperm.xlu0 %2153, %v1569_v11   ;;  %1750 = vperm.xlu1 %2154, %v1576_v45   ;;  %v1580_v45 = vld [vmem:[%s2883_s12 + $0x38] sm:$0xff]  ;;  %s2281_s12 = smov [#allocation4]  }
0x1879   :  { %s1802_s23 = sshll.u32 %s2281_s12, 4  ;;  %s1803_s23 = int_to_ptr.vmem [resolvable:$true] %s1802_s23 }
0x187a   :  { %s2251_s24 = scalar_lea.vmem %s1803_s23, 1024  ;;  %p2256_p1 = scmp.lt.s32.totalorder %s1803_s23, %s1803_s23 }
0x187b   :  { %p2252_p0 = scmp.ne.s32.totalorder %s1803_s23, %s2251_s24  ;;  %p2257_p2 = scmp.lt.s32.totalorder %s2251_s24, %s2251_s24 }
0x187c   :  { %1717 = vperm.xlu0 %2153, %v1571_v16   ;;  %1760 = vperm.xlu1 %2154, %v1578_v8  }
0x187d   :  { %p2258_p3 = por %p2257_p2, %p2256_p1 }
0x187f   :  { %p2259_p4 = pnand %p2258_p3, %p2252_p0 }
0x1880   :  { %1735 = vperm.xlu0 %2153, %v1573_v15  }
0x1884   :  { %1745 = vperm.xlu0 %2153, %v1575_v12  }
0x1888   :  { %1755 = vperm.xlu0 %2153, %v1577_v13  }
0x18e7   :  { %v1604_v31 = vpop.xlane.xlu0 %1603 }
0x18e8   :  { %v1612_v60 = vmul.f32 0.03125, %v1604_v31  ;;  %v1601_v22 = vpop.xlane.xlu1 %1600 }
0x18e9   :  { %v1611_v32 = vmul.f32 0.03125, %v1601_v22 }
0x18ea   :  { %v2823_v34 = vsub.f32 %v1562_v59, %v1612_v60 }
0x18eb   :  { %v2825_v38 = vsub.f32 %v1557_v0, %v1611_v32  ;;  %v1646_v39 = vpop.xlane.xlu0 %1645 }
0x18ec   :  { %v1658_v40 = vmul.f32 0.03125, %v1646_v39  ;;  %v1713_v41 = vpop.permute.xlu1 %1712  ;;  %v1628_v42 = vmul.f32 %v2823_v34, %v2823_v34 }
0x18ed   :  { %v1627_v43 = vmul.f32 %v2825_v38, %v2825_v38 }
0x18ee   :  { %v1666_v50 = vadd.f32 1e-05, %v1658_v40  ;;  %v1650_v51 = vsel %vm208_vm2, %v1628_v42, 0.0 }
0x18ef   :  { %1651 = vadd.xlane.f32.xlu0 %v1650_v51  ;;  %v1647_v56 = vsel %vm208_vm2, %v1627_v43, 0.0 }
0x18f0   :  { %2225 = vrsqrt.f32 %v1666_v50  ;;  %1648 = vadd.xlane.f32.xlu1 %v1647_v56  ;;  %v2833_v44 = vpop.permute.xlu1 %1722 }
0x18f1   :  { %2227 = vrsqrt.f32 %v1663_v18 }
0x18f2   :  { %2229 = vrsqrt.f32 %v1665_v58 }
0x18f3   :  { %v1693_v62 = vpop.permute.xlu0 %1692 }
0x18f4   :  { %v1726_v48 = vmul.f32 %v1693_v62, %v1678_v57  ;;  %v1741_v1 = vpop.permute.xlu1 %1740 }
0x18f6   :  { %v1774_v59 = vadd.f32 %v1741_v1, %v1726_v48 }
0x18f7   :  { %v1708_v0 = vpop.permute.xlu0 %1707 }
0x18f8   :  { %2231 = vtanh.f32 %v1774_v59  ;;  %v1751_v3 = vpop.permute.xlu1 %1750 }
0x18f9   :  { %v1776_v53 = vadd.f32 %v1751_v3, %v1728_v2 }
0x18fa   :  { %v2226_v5 = vpop.eup %2225 }
0x18fb   :  { %v1682_v6 = vmul.f32 %v2226_v5, %v2779_v63  ;;  %2233 = vtanh.f32 %v1776_v53  ;;  %v1718_v49 = vpop.permute.xlu0 %1717  ;;  %v2228_v10 = vpop.eup %2227 }
0x18fc   :  { %v1761_v11 = vpop.permute.xlu1 %1760  ;;  %v1679_v15 = vmul.f32 %v2228_v10, %v2747_v33  ;;  %v2230_v13 = vpop.eup %2229 }
0x18fd   :  { %v1730_v46 = vmul.f32 %v1713_v41, %v1682_v6  ;;  %v1681_v17 = vmul.f32 %v2230_v13, %v2761_v54 }
0x18fe   :  { %v1727_v36 = vmul.f32 %v2821_v25, %v1679_v15 }
0x18ff   :  { %v1778_v16 = vadd.f32 %v1761_v11, %v1730_v46  ;;  %v1736_v8 = vpop.permute.xlu0 %1735  ;;  %v1729_v33 = vmul.f32 %v1708_v0, %v1681_v17 }
0x1900   :  { %v1773_v12 = vadd.f32 %v1736_v8, %v1725_v9 }
0x1901   :  { %2235 = vtanh.f32 %v1778_v16  ;;  %1770 = vperm.xlu1 %2154, %v1580_v45  }
0x1902   :  { %v2232_v63 = vpop.eup %2231  ;;  %2237 = vtanh.f32 %v1773_v12 }
0x1903   :  { %1790 = vst.msk [vmem:[#allocation4 + $0x8] sm:$0xff] %vm208_vm2, %v2232_v63  ;;  %v1746_v14 = vpop.permute.xlu0 %1745 }
0x1904   :  { %v1775_v19 = vadd.f32 %v1746_v14, %v1727_v36 }
0x1905   :  { %v2234_v20 = vpop.eup %2233  ;;  %1765 = vperm.xlu0 %2153, %v1579_v47  }
0x1906   :  { %1792 = vst.msk [vmem:[#allocation4 + $0x18] sm:$0xff] %vm208_vm2, %v2234_v20  ;;  %2239 = vtanh.f32 %v1775_v19 }
0x1907   :  { %v1756_v21 = vpop.permute.xlu0 %1755 }
0x1908   :  { %v1777_v23 = vadd.f32 %v1756_v21, %v1729_v33 }
0x190a   :  { %2241 = vtanh.f32 %v1777_v23 }
0x190b   :  { %v2236_v24 = vpop.eup %2235 }
0x190c   :  { %v2238_v25 = vpop.eup %2237  ;;  %1794 = vst.msk [vmem:[#allocation4 + $0x28] sm:$0xff] %vm208_vm2, %v2236_v24 }
0x190d   :  { %1789 = vst.msk [vmem:[#allocation4] sm:$0xff] %vm208_vm2, %v2238_v25 }
0x1910   :  { %v2240_v27 = vpop.eup %2239 }
0x1911   :  { %1791 = vst.msk [vmem:[#allocation4 + $0x10] sm:$0xff] %vm208_vm2, %v2240_v27 }
0x1914   :  { %v2242_v54 = vpop.eup %2241 }
0x1915   :  { %1793 = vst.msk [vmem:[#allocation4 + $0x20] sm:$0xff] %vm208_vm2, %v2242_v54 }
0x197c   :  { %v1652_v28 = vpop.xlane.xlu0 %1651 }
0x197d   :  { %v1660_v29 = vmul.f32 0.03125, %v1652_v28  ;;  %v1649_v30 = vpop.xlane.xlu1 %1648 }
0x197e   :  { %v1659_v31 = vmul.f32 0.03125, %v1649_v30 }
0x197f   :  { %v1668_v60 = vadd.f32 1e-05, %v1660_v29 }
0x1980   :  { %v1667_v22 = vadd.f32 1e-05, %v1659_v31 }
0x1981   :  { %2243 = vrsqrt.f32 %v1668_v60  ;;  %v1771_v41 = vpop.permute.xlu1 %1770 }
0x1982   :  { %2245 = vrsqrt.f32 %v1667_v22 }
0x1984   :  { %v1766_v50 = vpop.permute.xlu0 %1765 }
0x198b   :  { %v2244_v32 = vpop.eup %2243 }
0x198c   :  { %v2246_v35 = vpop.eup %2245  ;;  %v1684_v37 = vmul.f32 %v2244_v32, %v2823_v34 }
0x198d   :  { %v1683_v39 = vmul.f32 %v2246_v35, %v2825_v38 }
0x198e   :  { %v1732_v40 = vmul.f32 %v2833_v44, %v1684_v37 }
0x198f   :  { %v1731_v42 = vmul.f32 %v1718_v49, %v1683_v39 }
0x1990   :  { %v1780_v43 = vadd.f32 %v1771_v41, %v1732_v40 }
0x1991   :  { %v1779_v51 = vadd.f32 %v1766_v50, %v1731_v42 }
0x1992   :  { %2247 = vtanh.f32 %v1780_v43 }
0x1993   :  { %2249 = vtanh.f32 %v1779_v51 }
0x199c   :  { %v2248_v52 = vpop.eup %2247 }
0x199d   :  { %v2250_v18 = vpop.eup %2249  ;;  %1796 = vst.msk [vmem:[#allocation4 + $0x38] sm:$0xff] %vm208_vm2, %v2248_v52 }
0x199e   :  { %1795 = vst.msk [vmem:[#allocation4 + $0x30] sm:$0xff] %vm208_vm2, %v2250_v18 }
0x199f   :  { %2262 = shalt.err (!%p2259_p4)
}
0x19a0   :  { %s2263_s28 = scalar_lea.hbm %s2884_s13, 1024 }
0x19a1   :  { %p2264_p5 = scmp.ne.s32.totalorder %s2884_s13, %s2263_s28  ;;  %p2267_p6 = scmp.lt.u32.totalorder %s2263_s28, %s2884_s13 }
0x19a3   :  { %p2269_p7 = pnand %p2267_p6, %p2264_p5 }
0x19a5   :  { %2272 = shalt.err (!%p2269_p7)
}
0x19a6   :  { %s2282_s14 = smov 128   ;;  %s2283_s15 = smov 8  }
0x19a7   :  { %1808 = dma.vmem_to_hbm [thread:$0]  %s1803_s23, 1024, %s2884_s13, [#allocation5], %s2282_s14, %s2282_s14, %s2283_s15  }
0x19a8   :  { %2273 = dma.done.wait [#allocation5], 1024  }
0x19a9   :  { %2274 = vsyncadd [#allocation5], 4294966272 }
0x19aa   :  { %1812 = vsyncpa [#allocation5], 1 }

</bundles_post_ra>
